<compile_context>
chip_gen: v5e
topology: v5e:2x2
jax: 0.10.0
libtpu: 0.0.40
codegen_flags: <defaults>
</compile_context>

<pallas_src>
import functools

import jax
import jax.numpy as jnp
from jax.experimental import pallas as pl
from jax.experimental.pallas import tpu as pltpu

SIZE_PAD = 8  # pad the 2 image-size features to an 8-deep contraction


# ----------------------------------------------------------------------------
# Fused kernel: whole CLIP vision tower + classifier head
# ----------------------------------------------------------------------------
def _clip_fused_kernel(
    num_heads,
    # ---- inputs -------------------------------------------------------------
    patches_ref,            # (1, npatch, C*P*P)   this batch's flattened patches
    patch_w_ref,            # (C*P*P, D)
    cls_pos_ref,            # (1, D)               class_emb + pos_emb[0]
    pos_rest_ref,           # (npatch, D)          pos_emb[1:]
    pre_g_ref, pre_b_ref,   # (1, D)               pre_layrnorm
    ln1_g_ref, ln1_b_ref,   # (1, 1, D)            per-layer (selected by index_map)
    qkv_w_ref,              # (1, D, 3D)
    qkv_b_ref,              # (1, 1, 3D)
    o_w_ref,                # (1, D, D)
    o_b_ref,                # (1, 1, D)
    ln2_g_ref, ln2_b_ref,   # (1, 1, D)
    fc1_w_ref,              # (1, D, MLP)
    fc1_b_ref,              # (1, 1, MLP)
    fc2_w_ref,              # (1, MLP, D)
    fc2_b_ref,              # (1, 1, D)
    post_g_ref, post_b_ref, # (1, D)               post_layernorm
    size_ref,               # (1, 1, SIZE_PAD)     [w, h, 0, ...] float32
    w1_emb_ref,             # (D, CH)              classifier Linear rows [0:D]
    w1_sz_ref,              # (SIZE_PAD, CH)       classifier Linear rows [D:D+2] (+ zero pad)
    b1_ref,                 # (1, CH)
    w2_ref,                 # (CH, 1)
    b2_ref,                 # (1, 1)
    # ---- outputs ------------------------------------------------------------
    logit_ref,              # (1, 1, 1)
    pooled_ref,             # (1, 1, D)            pooler_output (for verification)
    # ---- scratch ------------------------------------------------------------
    h_ref,                  # VMEM (S, D) f32 — activations, resident across layers
):
    layer = pl.program_id(1)
    S, D = h_ref.shape
    H = num_heads
    Dh = D // H
    scale = float(Dh) ** -0.5

    def _ln(x, g, b):
        mu = jnp.mean(x, axis=-1, keepdims=True)
        xc = x - mu
        var = jnp.mean(xc * xc, axis=-1, keepdims=True)
        return xc * jax.lax.rsqrt(var + 1e-5) * g + b

    # ---- grid step 0: patch embed (stride==kernel conv as matmul) + embeddings
    @pl.when(layer == 0)
    def _embed():
        emb = jnp.dot(patches_ref[0], patch_w_ref[...],
                      preferred_element_type=jnp.float32)           # (npatch, D)
        emb = emb + pos_rest_ref[...]
        # pre_layrnorm is per-row, so apply to CLS row and patch rows separately.
        h_ref[0:1, :] = _ln(cls_pos_ref[...], pre_g_ref[...], pre_b_ref[...])
        h_ref[1:S, :] = _ln(emb, pre_g_ref[...], pre_b_ref[...])

    # ---- one CLIP encoder layer (layer index == grid axis 1) -----------------
    x = h_ref[...]                                                   # (S, D) f32

    # self-attention block
    hn = _ln(x, ln1_g_ref[0], ln1_b_ref[0])
    qkv = jnp.dot(hn, qkv_w_ref[0],
                  preferred_element_type=jnp.float32) + qkv_b_ref[0]  # (S, 3D)
    q = qkv[:, 0:D] * scale
    k = qkv[:, D:2 * D]
    v = qkv[:, 2 * D:3 * D]

    # Heads via lane masks: D stays on the lane axis, no reshapes/transposes.
    lane = jax.lax.broadcasted_iota(jnp.int32, (S, D), 1)
    attn = jnp.zeros((S, D), jnp.float32)
    for hd in range(H):                                  # static unroll, H=4
        head_mask = ((lane >= hd * Dh) & (lane < (hd + 1) * Dh)).astype(jnp.float32)
        s = jnp.einsum("qd,kd->qk", q, k * head_mask,
                       preferred_element_type=jnp.float32)           # (S, S)
        s = s - jnp.max(s, axis=-1, keepdims=True)
        p = jnp.exp(s)
        p = p * pl.reciprocal(jnp.sum(p, axis=-1, keepdims=True), approx=True)
        attn = attn + jnp.dot(p, v, preferred_element_type=jnp.float32) * head_mask

    attn = jnp.dot(attn, o_w_ref[0],
                   preferred_element_type=jnp.float32) + o_b_ref[0]
    x = x + attn

    # MLP block (quick_gelu)
    hn2 = _ln(x, ln2_g_ref[0], ln2_b_ref[0])
    m = jnp.dot(hn2, fc1_w_ref[0],
                preferred_element_type=jnp.float32) + fc1_b_ref[0]
    m = m * jax.nn.sigmoid(1.702 * m)
    m = jnp.dot(m, fc2_w_ref[0],
                preferred_element_type=jnp.float32) + fc2_b_ref[0]
    h_ref[...] = x + m

    # ---- last grid step: pooler (post-LN of CLS token) + classifier head -----
    @pl.when(layer == pl.num_programs(1) - 1)
    def _head():
        pooled = _ln(h_ref[0:1, :], post_g_ref[...], post_b_ref[...])  # (1, D)
        pooled_ref[0] = pooled
        hid = (jnp.dot(pooled, w1_emb_ref[...], preferred_element_type=jnp.float32)
               + jnp.dot(size_ref[0], w1_sz_ref[...], preferred_element_type=jnp.float32)
               + b1_ref[...])                                          # (1, CH)
        hid = jnp.where(hid >= 0.0, hid, 0.2 * hid)                    # LeakyReLU(0.2)
        logit = jnp.dot(hid, w2_ref[...],
                        preferred_element_type=jnp.float32) + b2_ref[...]
        logit_ref[0] = logit


# ----------------------------------------------------------------------------
# Wrapper: one pallas_call for the whole forward
# ----------------------------------------------------------------------------
def clip_binary_classifier_forward(params, pixel_values, original_image_size,
                                   *, patch, heads):
    B, C, HH, WW = pixel_values.shape
    P = patch
    hp, wp = HH // P, WW // P
    npatch = hp * wp
    CPP = C * P * P
    D = params["patch_w"].shape[1]
    L = params["qkv_w"].shape[0]
    MLP = params["fc1_w"].shape[2]
    CH = params["cls_w1_emb"].shape[1]
    S = npatch + 1

    # stride==kernel Conv2d expressed as a matmul over (C, P, P)-flattened patches
    patches = pixel_values.reshape(B, C, hp, P, wp, P)
    patches = patches.transpose(0, 2, 4, 1, 3, 5).reshape(B, npatch, CPP)

    cls_pos = params["class_emb"] + params["pos_emb"][0:1, :]          # (1, D)
    pos_rest = params["pos_emb"][1:, :]                                # (npatch, D)

    size_f = original_image_size.astype(jnp.float32)                   # (B, 2)
    size_pad = jnp.zeros((B, 1, SIZE_PAD), jnp.float32).at[:, 0, :2].set(size_f)

    const2 = lambda b, l: (0, 0)
    const3 = lambda b, l: (0, 0, 0)
    perb3 = lambda b, l: (b, 0, 0)
    perl3 = lambda b, l: (l, 0, 0)

    in_specs = [
        pl.BlockSpec((1, npatch, CPP), perb3),       # patches
        pl.BlockSpec((CPP, D), const2),              # patch_w
        pl.BlockSpec((1, D), const2),                # cls_pos
        pl.BlockSpec((npatch, D), const2),           # pos_rest
        pl.BlockSpec((1, D), const2),                # pre_ln_g
        pl.BlockSpec((1, D), const2),                # pre_ln_b
        pl.BlockSpec((1, 1, D), perl3),              # ln1_g
        pl.BlockSpec((1, 1, D), perl3),              # ln1_b
        pl.BlockSpec((1, D, 3 * D), perl3),          # qkv_w (fused q|k|v)
        pl.BlockSpec((1, 1, 3 * D), perl3),          # qkv_b
        pl.BlockSpec((1, D, D), perl3),              # o_w
        pl.BlockSpec((1, 1, D), perl3),              # o_b
        pl.BlockSpec((1, 1, D), perl3),              # ln2_g
        pl.BlockSpec((1, 1, D), perl3),              # ln2_b
        pl.BlockSpec((1, D, MLP), perl3),            # fc1_w
        pl.BlockSpec((1, 1, MLP), perl3),            # fc1_b
        pl.BlockSpec((1, MLP, D), perl3),            # fc2_w
        pl.BlockSpec((1, 1, D), perl3),              # fc2_b
        pl.BlockSpec((1, D), const2),                # post_ln_g
        pl.BlockSpec((1, D), const2),                # post_ln_b
        pl.BlockSpec((1, 1, SIZE_PAD), perb3),       # padded image sizes
        pl.BlockSpec((D, CH), const2),               # cls_w1 (embedding rows)
        pl.BlockSpec((SIZE_PAD, CH), const2),        # cls_w1 (size rows, zero padded)
        pl.BlockSpec((1, CH), const2),               # cls_b1
        pl.BlockSpec((CH, 1), const2),               # cls_w2
        pl.BlockSpec((1, 1), const2),                # cls_b2
    ]

    logits, pooled = pl.pallas_call(
        functools.partial(_clip_fused_kernel, heads),
        out_shape=(
            jax.ShapeDtypeStruct((B, 1, 1), jnp.float32),   # logits
            jax.ShapeDtypeStruct((B, 1, D), jnp.float32),   # pooler_output
        ),
        grid=(B, L),
        in_specs=in_specs,
        out_specs=(
            pl.BlockSpec((1, 1, 1), perb3),
            pl.BlockSpec((1, 1, D), perb3),
        ),
        scratch_shapes=[pltpu.VMEM((S, D), jnp.float32)],
        compiler_params=pltpu.CompilerParams(
            dimension_semantics=("parallel", "arbitrary")),
        cost_estimate=pl.CostEstimate(
            flops=500_000, transcendentals=4_000, bytes_accessed=200_000),
    )(
        patches, params["patch_w"], cls_pos, pos_rest,
        params["pre_ln_g"], params["pre_ln_b"],
        params["ln1_g"], params["ln1_b"], params["qkv_w"], params["qkv_b"],
        params["o_w"], params["o_b"], params["ln2_g"], params["ln2_b"],
        params["fc1_w"], params["fc1_b"], params["fc2_w"], params["fc2_b"],
        params["post_ln_g"], params["post_ln_b"],
        size_pad, params["cls_w1_emb"], params["cls_w1_sz"],
        params["cls_b1"], params["cls_w2"], params["cls_b2"],
    )
    return logits.reshape(B, 1), pooled.reshape(B, D)


# ----------------------------------------------------------------------------
# Deterministic synthetic parameters (scaled-down CLIP vision config)
# ----------------------------------------------------------------------------
def init_params(key, *, C, P, D, MLP, S, layers, cls_hidden):
    keys = iter(jax.random.split(key, 16))

    def nrm(shape, s):
        return jax.random.normal(next(keys), shape, jnp.float32) * s

    L = layers
    return {
        "patch_w": nrm((C * P * P, D), 0.2),
        "class_emb": nrm((1, D), 0.2),
        "pos_emb": nrm((S, D), 0.2),
        "pre_ln_g": jnp.ones((1, D), jnp.float32),
        "pre_ln_b": jnp.zeros((1, D), jnp.float32),
        "post_ln_g": jnp.ones((1, D), jnp.float32),
        "post_ln_b": jnp.zeros((1, D), jnp.float32),
        "ln1_g": jnp.ones((L, 1, D), jnp.float32),
        "ln1_b": jnp.zeros((L, 1, D), jnp.float32),
        "qkv_w": nrm((L, D, 3 * D), 0.2),
        "qkv_b": jnp.zeros((L, 1, 3 * D), jnp.float32),
        "o_w": nrm((L, D, D), 0.2),
        "o_b": jnp.zeros((L, 1, D), jnp.float32),
        "ln2_g": jnp.ones((L, 1, D), jnp.float32),
        "ln2_b": jnp.zeros((L, 1, D), jnp.float32),
        "fc1_w": nrm((L, D, MLP), 0.2),
        "fc1_b": jnp.zeros((L, 1, MLP), jnp.float32),
        "fc2_w": nrm((L, MLP, D), 0.2),
        "fc2_b": jnp.zeros((L, 1, D), jnp.float32),
        # classifier: Linear(D+2, CH) split into embedding rows and size rows
        # (size rows zero-padded to SIZE_PAD for a clean in-kernel matmul)
        "cls_w1_emb": nrm((D, cls_hidden), 0.02),
        "cls_w1_sz": jnp.concatenate(
            [nrm((2, cls_hidden), 0.02),
             jnp.zeros((SIZE_PAD - 2, cls_hidden), jnp.float32)], axis=0),
        "cls_b1": jnp.zeros((1, cls_hidden), jnp.float32),
        "cls_w2": nrm((cls_hidden, 1), 0.02),
        "cls_b2": jnp.zeros((1, 1), jnp.float32),
    }


# ----------------------------------------------------------------------------
# Pure-JAX reference (for numerical verification of the fused kernel)
# ----------------------------------------------------------------------------
def _reference_forward(params, pixel_values, original_image_size, *, patch, heads):
    hp_mm = functools.partial(jnp.matmul, precision=jax.lax.Precision.HIGHEST)
    B, C, HH, WW = pixel_values.shape
    P = patch
    hpn, wpn = HH // P, WW // P
    npatch = hpn * wpn
    D = params["patch_w"].shape[1]
    L = params["qkv_w"].shape[0]
    H = heads
    Dh = D // H
    S = npatch + 1

    def ln(x, g, b):
        mu = jnp.mean(x, -1, keepdims=True)
        xc = x - mu
        var = jnp.mean(xc * xc, -1, keepdims=True)
        return xc * jax.lax.rsqrt(var + 1e-5) * g + b

    x = pixel_values.reshape(B, C, hpn, P, wpn, P)
    x = x.transpose(0, 2, 4, 1, 3, 5).reshape(B, npatch, C * P * P)
    emb = hp_mm(x, params["patch_w"])
    cls = jnp.broadcast_to(params["class_emb"][None, :, :], (B, 1, D))
    h = jnp.concatenate([cls, emb], axis=1) + params["pos_emb"][None]
    h = ln(h, params["pre_ln_g"][0], params["pre_ln_b"][0])

    for l in range(L):
        r = h
        hn = ln(h, params["ln1_g"][l, 0], params["ln1_b"][l, 0])
        qkv = hp_mm(hn, params["qkv_w"][l]) + params["qkv_b"][l, 0]
        q = qkv[..., :D] * (float(Dh) ** -0.5)
        k = qkv[..., D:2 * D]
        v = qkv[..., 2 * D:]
        qh = q.reshape(B, S, H, Dh).transpose(0, 2, 1, 3)
        kh = k.reshape(B, S, H, Dh).transpose(0, 2, 1, 3)
        vh = v.reshape(B, S, H, Dh).transpose(0, 2, 1, 3)
        s = jnp.einsum("bhqd,bhkd->bhqk", qh, kh,
                       precision=jax.lax.Precision.HIGHEST)
        p = jax.nn.softmax(s, axis=-1)
        o = jnp.einsum("bhqk,bhkd->bhqd", p, vh,
                       precision=jax.lax.Precision.HIGHEST)
        o = o.transpose(0, 2, 1, 3).reshape(B, S, D)
        h = r + hp_mm(o, params["o_w"][l]) + params["o_b"][l, 0]
        r = h
        hn2 = ln(h, params["ln2_g"][l, 0], params["ln2_b"][l, 0])
        m = hp_mm(hn2, params["fc1_w"][l]) + params["fc1_b"][l, 0]
        m = m * jax.nn.sigmoid(1.702 * m)
        h = r + hp_mm(m, params["fc2_w"][l]) + params["fc2_b"][l, 0]

    pooled = ln(h[:, 0, :], params["post_ln_g"][0], params["post_ln_b"][0])
    size_f = original_image_size.astype(jnp.float32)
    hid = (hp_mm(pooled, params["cls_w1_emb"])
           + hp_mm(size_f, params["cls_w1_sz"][:2, :])
           + params["cls_b1"][0])
    hid = jnp.where(hid >= 0.0, hid, 0.2 * hid)
    logits = hp_mm(hid, params["cls_w2"]) + params["cls_b2"][0]
    return logits, pooled


# ----------------------------------------------------------------------------
if __name__ == "__main__":
    # pixel_values: (B, C, H, W) NCHW; original_image_size: (B, 2) int
    B, C, IMG, P = 2, 3, 16, 8
    D, HEADS, LAYERS, MLP, CLS_HID = 32, 4, 2, 64, 32
    S = (IMG // P) * (IMG // P) + 1

    key = jax.random.PRNGKey(0)
    k_params, k_pix = jax.random.split(key)

    params = init_params(k_params, C=C, P=P, D=D, MLP=MLP, S=S,
                         layers=LAYERS, cls_hidden=CLS_HID)
    pixel_values = jax.random.normal(k_pix, (B, C, IMG, IMG), jnp.float32)
    original_image_size = jnp.array([[640, 480], [1024, 768]], dtype=jnp.int32)

    logits, pooled = clip_binary_classifier_forward(
        params, pixel_values, original_image_size, patch=P, heads=HEADS)
    logits, pooled = jax.block_until_ready((logits, pooled))

    ref_logits, ref_pooled = _reference_forward(
        params, pixel_values, original_image_size, patch=P, heads=HEADS)

    assert logits.shape == (B, 1), logits.shape
    assert jnp.allclose(pooled, ref_pooled, atol=5e-2, rtol=5e-2), (
        float(jnp.max(jnp.abs(pooled - ref_pooled))))
    assert jnp.allclose(logits, ref_logits, atol=5e-2, rtol=5e-2), (
        float(jnp.max(jnp.abs(logits - ref_logits))))
    print("KERNEL_OK")
</pallas_src>

<mosaic_0001>
module attributes {stable_mosaic.version = 11 : i64} {
  func.func @_clip_fused_kernel(%arg0: i32, %arg1: i32, %arg2: memref<1x4x192xf32, #tpu.memory_space<vmem>>, %arg3: memref<192x32xf32, #tpu.memory_space<vmem>>, %arg4: memref<1x32xf32, #tpu.memory_space<vmem>>, %arg5: memref<4x32xf32, #tpu.memory_space<vmem>>, %arg6: memref<1x32xf32, #tpu.memory_space<vmem>>, %arg7: memref<1x32xf32, #tpu.memory_space<vmem>>, %arg8: memref<1x1x32xf32, #tpu.memory_space<vmem>>, %arg9: memref<1x1x32xf32, #tpu.memory_space<vmem>>, %arg10: memref<1x32x96xf32, #tpu.memory_space<vmem>>, %arg11: memref<1x1x96xf32, #tpu.memory_space<vmem>>, %arg12: memref<1x32x32xf32, #tpu.memory_space<vmem>>, %arg13: memref<1x1x32xf32, #tpu.memory_space<vmem>>, %arg14: memref<1x1x32xf32, #tpu.memory_space<vmem>>, %arg15: memref<1x1x32xf32, #tpu.memory_space<vmem>>, %arg16: memref<1x32x64xf32, #tpu.memory_space<vmem>>, %arg17: memref<1x1x64xf32, #tpu.memory_space<vmem>>, %arg18: memref<1x64x32xf32, #tpu.memory_space<vmem>>, %arg19: memref<1x1x32xf32, #tpu.memory_space<vmem>>, %arg20: memref<1x32xf32, #tpu.memory_space<vmem>>, %arg21: memref<1x32xf32, #tpu.memory_space<vmem>>, %arg22: memref<1x1x8xf32, #tpu.memory_space<vmem>>, %arg23: memref<32x32xf32, #tpu.memory_space<vmem>>, %arg24: memref<8x32xf32, #tpu.memory_space<vmem>>, %arg25: memref<1x32xf32, #tpu.memory_space<vmem>>, %arg26: memref<32x1xf32, #tpu.memory_space<vmem>>, %arg27: memref<1x1xf32, #tpu.memory_space<vmem>>, %arg28: memref<1x1x1xf32, #tpu.memory_space<vmem>>, %arg29: memref<1x1x32xf32, #tpu.memory_space<vmem>>, %arg30: memref<5x32xf32, #tpu.memory_space<vmem>>) attributes {dimension_semantics = [#tpu.dimension_semantics<parallel>, #tpu.dimension_semantics<arbitrary>], iteration_bounds = array<i64: 2, 2>, scalar_prefetch = 0 : i64, scratch_operands = 1 : i64, tpu.core_type = #tpu.core_type<tc>, window_params = [{transform_indices = @transform_0, window_bounds = array<i64: 1, 4, 192>}, {pipeline_mode = #tpu.pipeline_mode<synchronous>, transform_indices = @transform_1, window_bounds = array<i64: 192, 32>}, {pipeline_mode = #tpu.pipeline_mode<synchronous>, transform_indices = @transform_2, window_bounds = array<i64: 1, 32>}, {pipeline_mode = #tpu.pipeline_mode<synchronous>, transform_indices = @transform_3, window_bounds = array<i64: 4, 32>}, {pipeline_mode = #tpu.pipeline_mode<synchronous>, transform_indices = @transform_4, window_bounds = array<i64: 1, 32>}, {pipeline_mode = #tpu.pipeline_mode<synchronous>, transform_indices = @transform_5, window_bounds = array<i64: 1, 32>}, {transform_indices = @transform_6, window_bounds = array<i64: 1, 1, 32>}, {transform_indices = @transform_7, window_bounds = array<i64: 1, 1, 32>}, {transform_indices = @transform_8, window_bounds = array<i64: 1, 32, 96>}, {transform_indices = @transform_9, window_bounds = array<i64: 1, 1, 96>}, {transform_indices = @transform_10, window_bounds = array<i64: 1, 32, 32>}, {transform_indices = @transform_11, window_bounds = array<i64: 1, 1, 32>}, {transform_indices = @transform_12, window_bounds = array<i64: 1, 1, 32>}, {transform_indices = @transform_13, window_bounds = array<i64: 1, 1, 32>}, {transform_indices = @transform_14, window_bounds = array<i64: 1, 32, 64>}, {transform_indices = @transform_15, window_bounds = array<i64: 1, 1, 64>}, {transform_indices = @transform_16, window_bounds = array<i64: 1, 64, 32>}, {transform_indices = @transform_17, window_bounds = array<i64: 1, 1, 32>}, {pipeline_mode = #tpu.pipeline_mode<synchronous>, transform_indices = @transform_18, window_bounds = array<i64: 1, 32>}, {pipeline_mode = #tpu.pipeline_mode<synchronous>, transform_indices = @transform_19, window_bounds = array<i64: 1, 32>}, {transform_indices = @transform_20, window_bounds = array<i64: 1, 1, 8>}, {pipeline_mode = #tpu.pipeline_mode<synchronous>, transform_indices = @transform_21, window_bounds = array<i64: 32, 32>}, {pipeline_mode = #tpu.pipeline_mode<synchronous>, transform_indices = @transform_22, window_bounds = array<i64: 8, 32>}, {pipeline_mode = #tpu.pipeline_mode<synchronous>, transform_indices = @transform_23, window_bounds = array<i64: 1, 32>}, {pipeline_mode = #tpu.pipeline_mode<synchronous>, transform_indices = @transform_24, window_bounds = array<i64: 32, 1>}, {pipeline_mode = #tpu.pipeline_mode<synchronous>, transform_indices = @transform_25, window_bounds = array<i64: 1, 1>}, {transform_indices = @transform_26, window_bounds = array<i64: 1, 1, 1>}, {transform_indices = @transform_27, window_bounds = array<i64: 1, 1, 32>}]} {
    %c0_i32 = arith.constant 0 : i32
    %0 = arith.cmpi eq, %arg1, %c0_i32 : i32
    %1 = arith.extui %0 : i1 to i32
    %c0_i32_0 = arith.constant 0 : i32
    %2 = arith.cmpi ne, %1, %c0_i32_0 : i32
    scf.if %2 {
      %c0_78 = arith.constant 0 : index
      %c0_79 = arith.constant 0 : index
      %c0_80 = arith.constant 0 : index
      %189 = vector.load %arg2[%c0_78, %c0_79, %c0_80] : memref<1x4x192xf32, #tpu.memory_space<vmem>>, vector<1x4x192xf32>
      %190 = vector.shape_cast %189 : vector<1x4x192xf32> to vector<4x192xf32>
      %c0_81 = arith.constant 0 : index
      %c0_82 = arith.constant 0 : index
      %191 = vector.load %arg3[%c0_81, %c0_82] : memref<192x32xf32, #tpu.memory_space<vmem>>, vector<192x32xf32>
      %cst_83 = arith.constant dense<0.000000e+00> : vector<4x32xf32>
      %192 = tpu.matmul %190, %191, %cst_83 {dimension_numbers = #tpu.dot_dimension_numbers<[1], [0], [0], [1], [0, 0, 1, 1], [], []>} : vector<4x192xf32>, vector<192x32xf32>, vector<4x32xf32> -> vector<4x32xf32>
      %c0_84 = arith.constant 0 : index
      %c0_85 = arith.constant 0 : index
      %193 = vector.load %arg5[%c0_84, %c0_85] : memref<4x32xf32, #tpu.memory_space<vmem>>, vector<4x32xf32>
      %194 = arith.addf %192, %193 : vector<4x32xf32>
      %c0_86 = arith.constant 0 : index
      %c0_87 = arith.constant 0 : index
      %195 = vector.load %arg4[%c0_86, %c0_87] : memref<1x32xf32, #tpu.memory_space<vmem>>, vector<1x32xf32>
      %c0_88 = arith.constant 0 : index
      %c0_89 = arith.constant 0 : index
      %196 = vector.load %arg6[%c0_88, %c0_89] : memref<1x32xf32, #tpu.memory_space<vmem>>, vector<1x32xf32>
      %c0_90 = arith.constant 0 : index
      %c0_91 = arith.constant 0 : index
      %197 = vector.load %arg7[%c0_90, %c0_91] : memref<1x32xf32, #tpu.memory_space<vmem>>, vector<1x32xf32>
      %cst_92 = arith.constant dense<0.000000e+00> : vector<1xf32>
      %198 = vector.multi_reduction <add>, %195, %cst_92 [1] : vector<1x32xf32> to vector<1xf32>
      %199 = vector.shape_cast %198 : vector<1xf32> to vector<1x1xf32>
      %cst_93 = arith.constant 3.200000e+01 : f32
      %200 = vector.broadcast %cst_93 : f32 to vector<1x1xf32>
      %201 = arith.divf %199, %200 : vector<1x1xf32>
      %202 = vector.broadcast %201 : vector<1x1xf32> to vector<1x32xf32>
      %203 = arith.subf %195, %202 : vector<1x32xf32>
      %204 = arith.mulf %203, %203 : vector<1x32xf32>
      %cst_94 = arith.constant dense<0.000000e+00> : vector<1xf32>
      %205 = vector.multi_reduction <add>, %204, %cst_94 [1] : vector<1x32xf32> to vector<1xf32>
      %206 = vector.shape_cast %205 : vector<1xf32> to vector<1x1xf32>
      %cst_95 = arith.constant 3.200000e+01 : f32
      %207 = vector.broadcast %cst_95 : f32 to vector<1x1xf32>
      %208 = arith.divf %206, %207 : vector<1x1xf32>
      %cst_96 = arith.constant 9.99999974E-6 : f32
      %209 = vector.broadcast %cst_96 : f32 to vector<1x1xf32>
      %210 = arith.addf %208, %209 : vector<1x1xf32>
      %211 = math.rsqrt %210 : vector<1x1xf32>
      %212 = vector.broadcast %211 : vector<1x1xf32> to vector<1x32xf32>
      %213 = arith.mulf %203, %212 : vector<1x32xf32>
      %214 = arith.mulf %213, %196 : vector<1x32xf32>
      %215 = arith.addf %214, %197 : vector<1x32xf32>
      %c0_97 = arith.constant 0 : index
      %c0_98 = arith.constant 0 : index
      %216 = vector.load %arg30[%c0_97, %c0_98] : memref<5x32xf32, #tpu.memory_space<vmem>>, vector<1x32xf32>
      tpu.vector_store %arg30[%c0_97, %c0_98], %215 {strides = array<i32>} : memref<5x32xf32, #tpu.memory_space<vmem>>, vector<1x32xf32>,
      %c0_99 = arith.constant 0 : index
      %c0_100 = arith.constant 0 : index
      %217 = vector.load %arg6[%c0_99, %c0_100] : memref<1x32xf32, #tpu.memory_space<vmem>>, vector<1x32xf32>
      %c0_101 = arith.constant 0 : index
      %c0_102 = arith.constant 0 : index
      %218 = vector.load %arg7[%c0_101, %c0_102] : memref<1x32xf32, #tpu.memory_space<vmem>>, vector<1x32xf32>
      %cst_103 = arith.constant dense<0.000000e+00> : vector<4xf32>
      %219 = vector.multi_reduction <add>, %194, %cst_103 [1] : vector<4x32xf32> to vector<4xf32>
      %220 = vector.shape_cast %219 : vector<4xf32> to vector<4x1xf32>
      %cst_104 = arith.constant 3.200000e+01 : f32
      %221 = vector.broadcast %cst_104 : f32 to vector<4x1xf32>
      %222 = arith.divf %220, %221 : vector<4x1xf32>
      %223 = vector.broadcast %222 : vector<4x1xf32> to vector<4x32xf32>
      %224 = arith.subf %194, %223 : vector<4x32xf32>
      %225 = arith.mulf %224, %224 : vector<4x32xf32>
      %cst_105 = arith.constant dense<0.000000e+00> : vector<4xf32>
      %226 = vector.multi_reduction <add>, %225, %cst_105 [1] : vector<4x32xf32> to vector<4xf32>
      %227 = vector.shape_cast %226 : vector<4xf32> to vector<4x1xf32>
      %cst_106 = arith.constant 3.200000e+01 : f32
      %228 = vector.broadcast %cst_106 : f32 to vector<4x1xf32>
      %229 = arith.divf %227, %228 : vector<4x1xf32>
      %cst_107 = arith.constant 9.99999974E-6 : f32
      %230 = vector.broadcast %cst_107 : f32 to vector<4x1xf32>
      %231 = arith.addf %229, %230 : vector<4x1xf32>
      %232 = math.rsqrt %231 : vector<4x1xf32>
      %233 = vector.broadcast %232 : vector<4x1xf32> to vector<4x32xf32>
      %234 = arith.mulf %224, %233 : vector<4x32xf32>
      %235 = vector.broadcast %217 : vector<1x32xf32> to vector<4x32xf32>
      %236 = arith.mulf %234, %235 : vector<4x32xf32>
      %237 = vector.broadcast %218 : vector<1x32xf32> to vector<4x32xf32>
      %238 = arith.addf %236, %237 : vector<4x32xf32>
      %c1 = arith.constant 1 : index
      %c0_108 = arith.constant 0 : index
      %239 = vector.load %arg30[%c1, %c0_108] : memref<5x32xf32, #tpu.memory_space<vmem>>, vector<4x32xf32>
      tpu.vector_store %arg30[%c1, %c0_108], %238 {strides = array<i32>} : memref<5x32xf32, #tpu.memory_space<vmem>>, vector<4x32xf32>,
    } else {
    }
    %c0 = arith.constant 0 : index
    %c0_1 = arith.constant 0 : index
    %3 = vector.load %arg30[%c0, %c0_1] : memref<5x32xf32, #tpu.memory_space<vmem>>, vector<5x32xf32>
    %c0_2 = arith.constant 0 : index
    %c0_3 = arith.constant 0 : index
    %c0_4 = arith.constant 0 : index
    %4 = vector.load %arg8[%c0_2, %c0_3, %c0_4] : memref<1x1x32xf32, #tpu.memory_space<vmem>>, vector<1x1x32xf32>
    %5 = vector.shape_cast %4 : vector<1x1x32xf32> to vector<1x32xf32>
    %c0_5 = arith.constant 0 : index
    %c0_6 = arith.constant 0 : index
    %c0_7 = arith.constant 0 : index
    %6 = vector.load %arg9[%c0_5, %c0_6, %c0_7] : memref<1x1x32xf32, #tpu.memory_space<vmem>>, vector<1x1x32xf32>
    %7 = vector.shape_cast %6 : vector<1x1x32xf32> to vector<1x32xf32>
    %cst = arith.constant dense<0.000000e+00> : vector<5xf32>
    %8 = vector.multi_reduction <add>, %3, %cst [1] : vector<5x32xf32> to vector<5xf32>
    %9 = vector.shape_cast %8 : vector<5xf32> to vector<5x1xf32>
    %cst_8 = arith.constant 3.200000e+01 : f32
    %10 = vector.broadcast %cst_8 : f32 to vector<5x1xf32>
    %11 = arith.divf %9, %10 : vector<5x1xf32>
    %12 = vector.broadcast %11 : vector<5x1xf32> to vector<5x32xf32>
    %13 = arith.subf %3, %12 : vector<5x32xf32>
    %14 = arith.mulf %13, %13 : vector<5x32xf32>
    %cst_9 = arith.constant dense<0.000000e+00> : vector<5xf32>
    %15 = vector.multi_reduction <add>, %14, %cst_9 [1] : vector<5x32xf32> to vector<5xf32>
    %16 = vector.shape_cast %15 : vector<5xf32> to vector<5x1xf32>
    %cst_10 = arith.constant 3.200000e+01 : f32
    %17 = vector.broadcast %cst_10 : f32 to vector<5x1xf32>
    %18 = arith.divf %16, %17 : vector<5x1xf32>
    %cst_11 = arith.constant 9.99999974E-6 : f32
    %19 = vector.broadcast %cst_11 : f32 to vector<5x1xf32>
    %20 = arith.addf %18, %19 : vector<5x1xf32>
    %21 = math.rsqrt %20 : vector<5x1xf32>
    %22 = vector.broadcast %21 : vector<5x1xf32> to vector<5x32xf32>
    %23 = arith.mulf %13, %22 : vector<5x32xf32>
    %24 = vector.broadcast %5 : vector<1x32xf32> to vector<5x32xf32>
    %25 = arith.mulf %23, %24 : vector<5x32xf32>
    %26 = vector.broadcast %7 : vector<1x32xf32> to vector<5x32xf32>
    %27 = arith.addf %25, %26 : vector<5x32xf32>
    %c0_12 = arith.constant 0 : index
    %c0_13 = arith.constant 0 : index
    %c0_14 = arith.constant 0 : index
    %28 = vector.load %arg10[%c0_12, %c0_13, %c0_14] : memref<1x32x96xf32, #tpu.memory_space<vmem>>, vector<1x32x96xf32>
    %29 = vector.shape_cast %28 : vector<1x32x96xf32> to vector<32x96xf32>
    %cst_15 = arith.constant dense<0.000000e+00> : vector<5x96xf32>
    %30 = tpu.matmul %27, %29, %cst_15 {dimension_numbers = #tpu.dot_dimension_numbers<[1], [0], [0], [1], [0, 0, 1, 1], [], []>} : vector<5x32xf32>, vector<32x96xf32>, vector<5x96xf32> -> vector<5x96xf32>
    %c0_16 = arith.constant 0 : index
    %c0_17 = arith.constant 0 : index
    %c0_18 = arith.constant 0 : index
    %31 = vector.load %arg11[%c0_16, %c0_17, %c0_18] : memref<1x1x96xf32, #tpu.memory_space<vmem>>, vector<1x1x96xf32>
    %32 = vector.shape_cast %31 : vector<1x1x96xf32> to vector<1x96xf32>
    %33 = vector.broadcast %32 : vector<1x96xf32> to vector<5x96xf32>
    %34 = arith.addf %30, %33 : vector<5x96xf32>
    %35 = vector.extract_strided_slice %34 {offsets = [0, 0], sizes = [5, 32], strides = [1, 1]} : vector<5x96xf32> to vector<5x32xf32>
    %cst_19 = arith.constant 0.353553385 : f32
    %36 = vector.broadcast %cst_19 : f32 to vector<5x32xf32>
    %37 = arith.mulf %35, %36 : vector<5x32xf32>
    %38 = vector.extract_strided_slice %34 {offsets = [0, 32], sizes = [5, 32], strides = [1, 1]} : vector<5x96xf32> to vector<5x32xf32>
    %39 = vector.extract_strided_slice %34 {offsets = [0, 64], sizes = [5, 32], strides = [1, 1]} : vector<5x96xf32> to vector<5x32xf32>
    %40 = tpu.iota {dimensions = array<i32: 1>} : vector<5x32xi32>
    %cst_20 = arith.constant 0.000000e+00 : f32
    %41 = vector.broadcast %cst_20 : f32 to vector<5x32xf32>
    %c0_i32_21 = arith.constant 0 : i32
    %42 = vector.broadcast %c0_i32_21 : i32 to vector<5x32xi32>
    %43 = arith.cmpi sge, %40, %42 : vector<5x32xi32>
    %c8_i32 = arith.constant 8 : i32
    %44 = vector.broadcast %c8_i32 : i32 to vector<5x32xi32>
    %45 = arith.cmpi slt, %40, %44 : vector<5x32xi32>
    %46 = arith.andi %43, %45 : vector<5x32xi1>
    %47 = arith.extui %46 : vector<5x32xi1> to vector<5x32xi32>
    %48 = arith.sitofp %47 : vector<5x32xi32> to vector<5x32xf32>
    %49 = arith.mulf %38, %48 : vector<5x32xf32>
    "tpu.trace_start"() <{level = 10 : i32, message = "qd,kd->qk"}> : () -> ()
    %cst_22 = arith.constant dense<0.000000e+00> : vector<5x5xf32>
    %50 = tpu.matmul %37, %49, %cst_22 {dimension_numbers = #tpu.dot_dimension_numbers<[1], [1], [0], [0], [0, 0, 1, 0], [], []>} : vector<5x32xf32>, vector<5x32xf32>, vector<5x5xf32> -> vector<5x5xf32>
    "tpu.trace_stop"() : () -> ()
    %cst_23 = arith.constant dense<0xFF800000> : vector<5xf32>
    %51 = vector.multi_reduction <maximumf>, %50, %cst_23 [1] : vector<5x5xf32> to vector<5xf32>
    %52 = vector.shape_cast %51 : vector<5xf32> to vector<5x1xf32>
    %53 = vector.broadcast %52 : vector<5x1xf32> to vector<5x5xf32>
    %54 = arith.subf %50, %53 : vector<5x5xf32>
    %55 = math.exp %54 : vector<5x5xf32>
    %cst_24 = arith.constant dense<0.000000e+00> : vector<5xf32>
    %56 = vector.multi_reduction <add>, %55, %cst_24 [1] : vector<5x5xf32> to vector<5xf32>
    %57 = vector.shape_cast %56 : vector<5xf32> to vector<5x1xf32>
    %58 = tpu.reciprocal %57 {approx = true} : vector<5x1xf32> -> vector<5x1xf32>
    %59 = vector.broadcast %58 : vector<5x1xf32> to vector<5x5xf32>
    %60 = arith.mulf %55, %59 : vector<5x5xf32>
    %cst_25 = arith.constant dense<0.000000e+00> : vector<5x32xf32>
    %61 = tpu.matmul %60, %39, %cst_25 {dimension_numbers = #tpu.dot_dimension_numbers<[1], [0], [0], [1], [0, 0, 1, 1], [], []>} : vector<5x5xf32>, vector<5x32xf32>, vector<5x32xf32> -> vector<5x32xf32>
    %62 = arith.mulf %61, %48 : vector<5x32xf32>
    %63 = arith.addf %41, %62 : vector<5x32xf32>
    %c8_i32_26 = arith.constant 8 : i32
    %64 = vector.broadcast %c8_i32_26 : i32 to vector<5x32xi32>
    %65 = arith.cmpi sge, %40, %64 : vector<5x32xi32>
    %c16_i32 = arith.constant 16 : i32
    %66 = vector.broadcast %c16_i32 : i32 to vector<5x32xi32>
    %67 = arith.cmpi slt, %40, %66 : vector<5x32xi32>
    %68 = arith.andi %65, %67 : vector<5x32xi1>
    %69 = arith.extui %68 : vector<5x32xi1> to vector<5x32xi32>
    %70 = arith.sitofp %69 : vector<5x32xi32> to vector<5x32xf32>
    %71 = arith.mulf %38, %70 : vector<5x32xf32>
    "tpu.trace_start"() <{level = 10 : i32, message = "qd,kd->qk"}> : () -> ()
    %cst_27 = arith.constant dense<0.000000e+00> : vector<5x5xf32>
    %72 = tpu.matmul %37, %71, %cst_27 {dimension_numbers = #tpu.dot_dimension_numbers<[1], [1], [0], [0], [0, 0, 1, 0], [], []>} : vector<5x32xf32>, vector<5x32xf32>, vector<5x5xf32> -> vector<5x5xf32>
    "tpu.trace_stop"() : () -> ()
    %cst_28 = arith.constant dense<0xFF800000> : vector<5xf32>
    %73 = vector.multi_reduction <maximumf>, %72, %cst_28 [1] : vector<5x5xf32> to vector<5xf32>
    %74 = vector.shape_cast %73 : vector<5xf32> to vector<5x1xf32>
    %75 = vector.broadcast %74 : vector<5x1xf32> to vector<5x5xf32>
    %76 = arith.subf %72, %75 : vector<5x5xf32>
    %77 = math.exp %76 : vector<5x5xf32>
    %cst_29 = arith.constant dense<0.000000e+00> : vector<5xf32>
    %78 = vector.multi_reduction <add>, %77, %cst_29 [1] : vector<5x5xf32> to vector<5xf32>
    %79 = vector.shape_cast %78 : vector<5xf32> to vector<5x1xf32>
    %80 = tpu.reciprocal %79 {approx = true} : vector<5x1xf32> -> vector<5x1xf32>
    %81 = vector.broadcast %80 : vector<5x1xf32> to vector<5x5xf32>
    %82 = arith.mulf %77, %81 : vector<5x5xf32>
    %cst_30 = arith.constant dense<0.000000e+00> : vector<5x32xf32>
    %83 = tpu.matmul %82, %39, %cst_30 {dimension_numbers = #tpu.dot_dimension_numbers<[1], [0], [0], [1], [0, 0, 1, 1], [], []>} : vector<5x5xf32>, vector<5x32xf32>, vector<5x32xf32> -> vector<5x32xf32>
    %84 = arith.mulf %83, %70 : vector<5x32xf32>
    %85 = arith.addf %63, %84 : vector<5x32xf32>
    %c16_i32_31 = arith.constant 16 : i32
    %86 = vector.broadcast %c16_i32_31 : i32 to vector<5x32xi32>
    %87 = arith.cmpi sge, %40, %86 : vector<5x32xi32>
    %c24_i32 = arith.constant 24 : i32
    %88 = vector.broadcast %c24_i32 : i32 to vector<5x32xi32>
    %89 = arith.cmpi slt, %40, %88 : vector<5x32xi32>
    %90 = arith.andi %87, %89 : vector<5x32xi1>
    %91 = arith.extui %90 : vector<5x32xi1> to vector<5x32xi32>
    %92 = arith.sitofp %91 : vector<5x32xi32> to vector<5x32xf32>
    %93 = arith.mulf %38, %92 : vector<5x32xf32>
    "tpu.trace_start"() <{level = 10 : i32, message = "qd,kd->qk"}> : () -> ()
    %cst_32 = arith.constant dense<0.000000e+00> : vector<5x5xf32>
    %94 = tpu.matmul %37, %93, %cst_32 {dimension_numbers = #tpu.dot_dimension_numbers<[1], [1], [0], [0], [0, 0, 1, 0], [], []>} : vector<5x32xf32>, vector<5x32xf32>, vector<5x5xf32> -> vector<5x5xf32>
    "tpu.trace_stop"() : () -> ()
    %cst_33 = arith.constant dense<0xFF800000> : vector<5xf32>
    %95 = vector.multi_reduction <maximumf>, %94, %cst_33 [1] : vector<5x5xf32> to vector<5xf32>
    %96 = vector.shape_cast %95 : vector<5xf32> to vector<5x1xf32>
    %97 = vector.broadcast %96 : vector<5x1xf32> to vector<5x5xf32>
    %98 = arith.subf %94, %97 : vector<5x5xf32>
    %99 = math.exp %98 : vector<5x5xf32>
    %cst_34 = arith.constant dense<0.000000e+00> : vector<5xf32>
    %100 = vector.multi_reduction <add>, %99, %cst_34 [1] : vector<5x5xf32> to vector<5xf32>
    %101 = vector.shape_cast %100 : vector<5xf32> to vector<5x1xf32>
    %102 = tpu.reciprocal %101 {approx = true} : vector<5x1xf32> -> vector<5x1xf32>
    %103 = vector.broadcast %102 : vector<5x1xf32> to vector<5x5xf32>
    %104 = arith.mulf %99, %103 : vector<5x5xf32>
    %cst_35 = arith.constant dense<0.000000e+00> : vector<5x32xf32>
    %105 = tpu.matmul %104, %39, %cst_35 {dimension_numbers = #tpu.dot_dimension_numbers<[1], [0], [0], [1], [0, 0, 1, 1], [], []>} : vector<5x5xf32>, vector<5x32xf32>, vector<5x32xf32> -> vector<5x32xf32>
    %106 = arith.mulf %105, %92 : vector<5x32xf32>
    %107 = arith.addf %85, %106 : vector<5x32xf32>
    %c24_i32_36 = arith.constant 24 : i32
    %108 = vector.broadcast %c24_i32_36 : i32 to vector<5x32xi32>
    %109 = arith.cmpi sge, %40, %108 : vector<5x32xi32>
    %c32_i32 = arith.constant 32 : i32
    %110 = vector.broadcast %c32_i32 : i32 to vector<5x32xi32>
    %111 = arith.cmpi slt, %40, %110 : vector<5x32xi32>
    %112 = arith.andi %109, %111 : vector<5x32xi1>
    %113 = arith.extui %112 : vector<5x32xi1> to vector<5x32xi32>
    %114 = arith.sitofp %113 : vector<5x32xi32> to vector<5x32xf32>
    %115 = arith.mulf %38, %114 : vector<5x32xf32>
    "tpu.trace_start"() <{level = 10 : i32, message = "qd,kd->qk"}> : () -> ()
    %cst_37 = arith.constant dense<0.000000e+00> : vector<5x5xf32>
    %116 = tpu.matmul %37, %115, %cst_37 {dimension_numbers = #tpu.dot_dimension_numbers<[1], [1], [0], [0], [0, 0, 1, 0], [], []>} : vector<5x32xf32>, vector<5x32xf32>, vector<5x5xf32> -> vector<5x5xf32>
    "tpu.trace_stop"() : () -> ()
    %cst_38 = arith.constant dense<0xFF800000> : vector<5xf32>
    %117 = vector.multi_reduction <maximumf>, %116, %cst_38 [1] : vector<5x5xf32> to vector<5xf32>
    %118 = vector.shape_cast %117 : vector<5xf32> to vector<5x1xf32>
    %119 = vector.broadcast %118 : vector<5x1xf32> to vector<5x5xf32>
    %120 = arith.subf %116, %119 : vector<5x5xf32>
    %121 = math.exp %120 : vector<5x5xf32>
    %cst_39 = arith.constant dense<0.000000e+00> : vector<5xf32>
    %122 = vector.multi_reduction <add>, %121, %cst_39 [1] : vector<5x5xf32> to vector<5xf32>
    %123 = vector.shape_cast %122 : vector<5xf32> to vector<5x1xf32>
    %124 = tpu.reciprocal %123 {approx = true} : vector<5x1xf32> -> vector<5x1xf32>
    %125 = vector.broadcast %124 : vector<5x1xf32> to vector<5x5xf32>
    %126 = arith.mulf %121, %125 : vector<5x5xf32>
    %cst_40 = arith.constant dense<0.000000e+00> : vector<5x32xf32>
    %127 = tpu.matmul %126, %39, %cst_40 {dimension_numbers = #tpu.dot_dimension_numbers<[1], [0], [0], [1], [0, 0, 1, 1], [], []>} : vector<5x5xf32>, vector<5x32xf32>, vector<5x32xf32> -> vector<5x32xf32>
    %128 = arith.mulf %127, %114 : vector<5x32xf32>
    %129 = arith.addf %107, %128 : vector<5x32xf32>
    %c0_41 = arith.constant 0 : index
    %c0_42 = arith.constant 0 : index
    %c0_43 = arith.constant 0 : index
    %130 = vector.load %arg12[%c0_41, %c0_42, %c0_43] : memref<1x32x32xf32, #tpu.memory_space<vmem>>, vector<1x32x32xf32>
    %131 = vector.shape_cast %130 : vector<1x32x32xf32> to vector<32x32xf32>
    %cst_44 = arith.constant dense<0.000000e+00> : vector<5x32xf32>
    %132 = tpu.matmul %129, %131, %cst_44 {dimension_numbers = #tpu.dot_dimension_numbers<[1], [0], [0], [1], [0, 0, 1, 1], [], []>} : vector<5x32xf32>, vector<32x32xf32>, vector<5x32xf32> -> vector<5x32xf32>
    %c0_45 = arith.constant 0 : index
    %c0_46 = arith.constant 0 : index
    %c0_47 = arith.constant 0 : index
    %133 = vector.load %arg13[%c0_45, %c0_46, %c0_47] : memref<1x1x32xf32, #tpu.memory_space<vmem>>, vector<1x1x32xf32>
    %134 = vector.shape_cast %133 : vector<1x1x32xf32> to vector<1x32xf32>
    %135 = vector.broadcast %134 : vector<1x32xf32> to vector<5x32xf32>
    %136 = arith.addf %132, %135 : vector<5x32xf32>
    %137 = arith.addf %3, %136 : vector<5x32xf32>
    %c0_48 = arith.constant 0 : index
    %c0_49 = arith.constant 0 : index
    %c0_50 = arith.constant 0 : index
    %138 = vector.load %arg14[%c0_48, %c0_49, %c0_50] : memref<1x1x32xf32, #tpu.memory_space<vmem>>, vector<1x1x32xf32>
    %139 = vector.shape_cast %138 : vector<1x1x32xf32> to vector<1x32xf32>
    %c0_51 = arith.constant 0 : index
    %c0_52 = arith.constant 0 : index
    %c0_53 = arith.constant 0 : index
    %140 = vector.load %arg15[%c0_51, %c0_52, %c0_53] : memref<1x1x32xf32, #tpu.memory_space<vmem>>, vector<1x1x32xf32>
    %141 = vector.shape_cast %140 : vector<1x1x32xf32> to vector<1x32xf32>
    %cst_54 = arith.constant dense<0.000000e+00> : vector<5xf32>
    %142 = vector.multi_reduction <add>, %137, %cst_54 [1] : vector<5x32xf32> to vector<5xf32>
    %143 = vector.shape_cast %142 : vector<5xf32> to vector<5x1xf32>
    %cst_55 = arith.constant 3.200000e+01 : f32
    %144 = vector.broadcast %cst_55 : f32 to vector<5x1xf32>
    %145 = arith.divf %143, %144 : vector<5x1xf32>
    %146 = vector.broadcast %145 : vector<5x1xf32> to vector<5x32xf32>
    %147 = arith.subf %137, %146 : vector<5x32xf32>
    %148 = arith.mulf %147, %147 : vector<5x32xf32>
    %cst_56 = arith.constant dense<0.000000e+00> : vector<5xf32>
    %149 = vector.multi_reduction <add>, %148, %cst_56 [1] : vector<5x32xf32> to vector<5xf32>
    %150 = vector.shape_cast %149 : vector<5xf32> to vector<5x1xf32>
    %cst_57 = arith.constant 3.200000e+01 : f32
    %151 = vector.broadcast %cst_57 : f32 to vector<5x1xf32>
    %152 = arith.divf %150, %151 : vector<5x1xf32>
    %cst_58 = arith.constant 9.99999974E-6 : f32
    %153 = vector.broadcast %cst_58 : f32 to vector<5x1xf32>
    %154 = arith.addf %152, %153 : vector<5x1xf32>
    %155 = math.rsqrt %154 : vector<5x1xf32>
    %156 = vector.broadcast %155 : vector<5x1xf32> to vector<5x32xf32>
    %157 = arith.mulf %147, %156 : vector<5x32xf32>
    %158 = vector.broadcast %139 : vector<1x32xf32> to vector<5x32xf32>
    %159 = arith.mulf %157, %158 : vector<5x32xf32>
    %160 = vector.broadcast %141 : vector<1x32xf32> to vector<5x32xf32>
    %161 = arith.addf %159, %160 : vector<5x32xf32>
    %c0_59 = arith.constant 0 : index
    %c0_60 = arith.constant 0 : index
    %c0_61 = arith.constant 0 : index
    %162 = vector.load %arg16[%c0_59, %c0_60, %c0_61] : memref<1x32x64xf32, #tpu.memory_space<vmem>>, vector<1x32x64xf32>
    %163 = vector.shape_cast %162 : vector<1x32x64xf32> to vector<32x64xf32>
    %cst_62 = arith.constant dense<0.000000e+00> : vector<5x64xf32>
    %164 = tpu.matmul %161, %163, %cst_62 {dimension_numbers = #tpu.dot_dimension_numbers<[1], [0], [0], [1], [0, 0, 1, 1], [], []>} : vector<5x32xf32>, vector<32x64xf32>, vector<5x64xf32> -> vector<5x64xf32>
    %c0_63 = arith.constant 0 : index
    %c0_64 = arith.constant 0 : index
    %c0_65 = arith.constant 0 : index
    %165 = vector.load %arg17[%c0_63, %c0_64, %c0_65] : memref<1x1x64xf32, #tpu.memory_space<vmem>>, vector<1x1x64xf32>
    %166 = vector.shape_cast %165 : vector<1x1x64xf32> to vector<1x64xf32>
    %167 = vector.broadcast %166 : vector<1x64xf32> to vector<5x64xf32>
    %168 = arith.addf %164, %167 : vector<5x64xf32>
    %cst_66 = arith.constant 1.702000e+00 : f32
    %169 = vector.broadcast %cst_66 : f32 to vector<5x64xf32>
    %170 = arith.mulf %169, %168 : vector<5x64xf32>
    %171 = arith.negf %170 : vector<5x64xf32>
    %172 = math.exp %171 : vector<5x64xf32>
    %cst_67 = arith.constant 1.000000e+00 : f32
    %173 = vector.broadcast %cst_67 : f32 to vector<5x64xf32>
    %174 = arith.addf %173, %172 : vector<5x64xf32>
    %175 = arith.divf %173, %174 : vector<5x64xf32>
    %176 = arith.mulf %168, %175 : vector<5x64xf32>
    %c0_68 = arith.constant 0 : index
    %c0_69 = arith.constant 0 : index
    %c0_70 = arith.constant 0 : index
    %177 = vector.load %arg18[%c0_68, %c0_69, %c0_70] : memref<1x64x32xf32, #tpu.memory_space<vmem>>, vector<1x64x32xf32>
    %178 = vector.shape_cast %177 : vector<1x64x32xf32> to vector<64x32xf32>
    %cst_71 = arith.constant dense<0.000000e+00> : vector<5x32xf32>
    %179 = tpu.matmul %176, %178, %cst_71 {dimension_numbers = #tpu.dot_dimension_numbers<[1], [0], [0], [1], [0, 0, 1, 1], [], []>} : vector<5x64xf32>, vector<64x32xf32>, vector<5x32xf32> -> vector<5x32xf32>
    %c0_72 = arith.constant 0 : index
    %c0_73 = arith.constant 0 : index
    %c0_74 = arith.constant 0 : index
    %180 = vector.load %arg19[%c0_72, %c0_73, %c0_74] : memref<1x1x32xf32, #tpu.memory_space<vmem>>, vector<1x1x32xf32>
    %181 = vector.shape_cast %180 : vector<1x1x32xf32> to vector<1x32xf32>
    %182 = vector.broadcast %181 : vector<1x32xf32> to vector<5x32xf32>
    %183 = arith.addf %179, %182 : vector<5x32xf32>
    %184 = arith.addf %137, %183 : vector<5x32xf32>
    %c0_75 = arith.constant 0 : index
    %c0_76 = arith.constant 0 : index
    %185 = vector.load %arg30[%c0_75, %c0_76] : memref<5x32xf32, #tpu.memory_space<vmem>>, vector<5x32xf32>
    tpu.vector_store %arg30[%c0_75, %c0_76], %184 {strides = array<i32>} : memref<5x32xf32, #tpu.memory_space<vmem>>, vector<5x32xf32>,
    %c1_i32 = arith.constant 1 : i32
    %186 = arith.cmpi eq, %arg1, %c1_i32 : i32
    %187 = arith.extui %186 : i1 to i32
    %c0_i32_77 = arith.constant 0 : i32
    %188 = arith.cmpi ne, %187, %c0_i32_77 : i32
    scf.if %188 {
      %c0_78 = arith.constant 0 : index
      %c0_79 = arith.constant 0 : index
      %189 = vector.load %arg30[%c0_78, %c0_79] : memref<5x32xf32, #tpu.memory_space<vmem>>, vector<1x32xf32>
      %c0_80 = arith.constant 0 : index
      %c0_81 = arith.constant 0 : index
      %190 = vector.load %arg20[%c0_80, %c0_81] : memref<1x32xf32, #tpu.memory_space<vmem>>, vector<1x32xf32>
      %c0_82 = arith.constant 0 : index
      %c0_83 = arith.constant 0 : index
      %191 = vector.load %arg21[%c0_82, %c0_83] : memref<1x32xf32, #tpu.memory_space<vmem>>, vector<1x32xf32>
      %cst_84 = arith.constant dense<0.000000e+00> : vector<1xf32>
      %192 = vector.multi_reduction <add>, %189, %cst_84 [1] : vector<1x32xf32> to vector<1xf32>
      %193 = vector.shape_cast %192 : vector<1xf32> to vector<1x1xf32>
      %cst_85 = arith.constant 3.200000e+01 : f32
      %194 = vector.broadcast %cst_85 : f32 to vector<1x1xf32>
      %195 = arith.divf %193, %194 : vector<1x1xf32>
      %196 = vector.broadcast %195 : vector<1x1xf32> to vector<1x32xf32>
      %197 = arith.subf %189, %196 : vector<1x32xf32>
      %198 = arith.mulf %197, %197 : vector<1x32xf32>
      %cst_86 = arith.constant dense<0.000000e+00> : vector<1xf32>
      %199 = vector.multi_reduction <add>, %198, %cst_86 [1] : vector<1x32xf32> to vector<1xf32>
      %200 = vector.shape_cast %199 : vector<1xf32> to vector<1x1xf32>
      %cst_87 = arith.constant 3.200000e+01 : f32
      %201 = vector.broadcast %cst_87 : f32 to vector<1x1xf32>
      %202 = arith.divf %200, %201 : vector<1x1xf32>
      %cst_88 = arith.constant 9.99999974E-6 : f32
      %203 = vector.broadcast %cst_88 : f32 to vector<1x1xf32>
      %204 = arith.addf %202, %203 : vector<1x1xf32>
      %205 = math.rsqrt %204 : vector<1x1xf32>
      %206 = vector.broadcast %205 : vector<1x1xf32> to vector<1x32xf32>
      %207 = arith.mulf %197, %206 : vector<1x32xf32>
      %208 = arith.mulf %207, %190 : vector<1x32xf32>
      %209 = arith.addf %208, %191 : vector<1x32xf32>
      %c0_89 = arith.constant 0 : index
      %c0_90 = arith.constant 0 : index
      %c0_91 = arith.constant 0 : index
      %210 = vector.load %arg29[%c0_89, %c0_90, %c0_91] : memref<1x1x32xf32, #tpu.memory_space<vmem>>, vector<1x1x32xf32>
      %211 = vector.shape_cast %210 : vector<1x1x32xf32> to vector<1x32xf32>
      %212 = vector.shape_cast %209 : vector<1x32xf32> to vector<1x1x32xf32>
      tpu.vector_store %arg29[%c0_89, %c0_90, %c0_91], %212 {strides = array<i32>} : memref<1x1x32xf32, #tpu.memory_space<vmem>>, vector<1x1x32xf32>,
      %c0_92 = arith.constant 0 : index
      %c0_93 = arith.constant 0 : index
      %213 = vector.load %arg23[%c0_92, %c0_93] : memref<32x32xf32, #tpu.memory_space<vmem>>, vector<32x32xf32>
      %cst_94 = arith.constant dense<0.000000e+00> : vector<1x32xf32>
      %214 = tpu.matmul %209, %213, %cst_94 {dimension_numbers = #tpu.dot_dimension_numbers<[1], [0], [0], [1], [0, 0, 1, 1], [], []>} : vector<1x32xf32>, vector<32x32xf32>, vector<1x32xf32> -> vector<1x32xf32>
      %c0_95 = arith.constant 0 : index
      %c0_96 = arith.constant 0 : index
      %c0_97 = arith.constant 0 : index
      %215 = vector.load %arg22[%c0_95, %c0_96, %c0_97] : memref<1x1x8xf32, #tpu.memory_space<vmem>>, vector<1x1x8xf32>
      %216 = vector.shape_cast %215 : vector<1x1x8xf32> to vector<1x8xf32>
      %c0_98 = arith.constant 0 : index
      %c0_99 = arith.constant 0 : index
      %217 = vector.load %arg24[%c0_98, %c0_99] : memref<8x32xf32, #tpu.memory_space<vmem>>, vector<8x32xf32>
      %cst_100 = arith.constant dense<0.000000e+00> : vector<1x32xf32>
      %218 = tpu.matmul %216, %217, %cst_100 {dimension_numbers = #tpu.dot_dimension_numbers<[1], [0], [0], [1], [0, 0, 1, 1], [], []>} : vector<1x8xf32>, vector<8x32xf32>, vector<1x32xf32> -> vector<1x32xf32>
      %219 = arith.addf %214, %218 : vector<1x32xf32>
      %c0_101 = arith.constant 0 : index
      %c0_102 = arith.constant 0 : index
      %220 = vector.load %arg25[%c0_101, %c0_102] : memref<1x32xf32, #tpu.memory_space<vmem>>, vector<1x32xf32>
      %221 = arith.addf %219, %220 : vector<1x32xf32>
      %cst_103 = arith.constant 0.000000e+00 : f32
      %222 = vector.broadcast %cst_103 : f32 to vector<1x32xf32>
      %223 = arith.cmpf oge, %221, %222 : vector<1x32xf32>
      %cst_104 = arith.constant 2.000000e-01 : f32
      %224 = vector.broadcast %cst_104 : f32 to vector<1x32xf32>
      %225 = arith.mulf %224, %221 : vector<1x32xf32>
      %226 = arith.select %223, %221, %225 : vector<1x32xi1>, vector<1x32xf32>
      %c0_105 = arith.constant 0 : index
      %c0_106 = arith.constant 0 : index
      %227 = vector.load %arg26[%c0_105, %c0_106] : memref<32x1xf32, #tpu.memory_space<vmem>>, vector<32x1xf32>
      %cst_107 = arith.constant dense<0.000000e+00> : vector<1x1xf32>
      %228 = tpu.matmul %226, %227, %cst_107 {dimension_numbers = #tpu.dot_dimension_numbers<[1], [0], [0], [1], [0, 0, 1, 1], [], []>} : vector<1x32xf32>, vector<32x1xf32>, vector<1x1xf32> -> vector<1x1xf32>
      %c0_108 = arith.constant 0 : index
      %c0_109 = arith.constant 0 : index
      %229 = vector.load %arg27[%c0_108, %c0_109] : memref<1x1xf32, #tpu.memory_space<vmem>>, vector<1x1xf32>
      %230 = arith.addf %228, %229 : vector<1x1xf32>
      %c0_110 = arith.constant 0 : index
      %c0_111 = arith.constant 0 : index
      %c0_112 = arith.constant 0 : index
      %231 = vector.load %arg28[%c0_110, %c0_111, %c0_112] : memref<1x1x1xf32, #tpu.memory_space<vmem>>, vector<1x1x1xf32>
      %232 = vector.shape_cast %231 : vector<1x1x1xf32> to vector<1x1xf32>
      %233 = vector.shape_cast %230 : vector<1x1xf32> to vector<1x1x1xf32>
      tpu.vector_store %arg28[%c0_110, %c0_111, %c0_112], %233 {strides = array<i32>} : memref<1x1x1xf32, #tpu.memory_space<vmem>>, vector<1x1x1xf32>,
    } else {
    }
    return
  }
  func.func @transform_0(%arg0: i32, %arg1: i32) -> (i32, i32, i32) {
    %c0_i32 = arith.constant 0 : i32
    %c0_i32_0 = arith.constant 0 : i32
    %c0_i32_1 = arith.constant 0 : i32
    return %arg0, %c0_i32, %c0_i32_0 : i32, i32, i32
  }
  func.func @transform_1(%arg0: i32, %arg1: i32) -> (i32, i32) {
    %c0_i32 = arith.constant 0 : i32
    %c0_i32_0 = arith.constant 0 : i32
    %c0_i32_1 = arith.constant 0 : i32
    return %c0_i32, %c0_i32_0 : i32, i32
  }
  func.func @transform_2(%arg0: i32, %arg1: i32) -> (i32, i32) {
    %c0_i32 = arith.constant 0 : i32
    %c0_i32_0 = arith.constant 0 : i32
    %c0_i32_1 = arith.constant 0 : i32
    return %c0_i32, %c0_i32_0 : i32, i32
  }
  func.func @transform_3(%arg0: i32, %arg1: i32) -> (i32, i32) {
    %c0_i32 = arith.constant 0 : i32
    %c0_i32_0 = arith.constant 0 : i32
    %c0_i32_1 = arith.constant 0 : i32
    return %c0_i32, %c0_i32_0 : i32, i32
  }
  func.func @transform_4(%arg0: i32, %arg1: i32) -> (i32, i32) {
    %c0_i32 = arith.constant 0 : i32
    %c0_i32_0 = arith.constant 0 : i32
    %c0_i32_1 = arith.constant 0 : i32
    return %c0_i32, %c0_i32_0 : i32, i32
  }
  func.func @transform_5(%arg0: i32, %arg1: i32) -> (i32, i32) {
    %c0_i32 = arith.constant 0 : i32
    %c0_i32_0 = arith.constant 0 : i32
    %c0_i32_1 = arith.constant 0 : i32
    return %c0_i32, %c0_i32_0 : i32, i32
  }
  func.func @transform_6(%arg0: i32, %arg1: i32) -> (i32, i32, i32) {
    %c0_i32 = arith.constant 0 : i32
    %c0_i32_0 = arith.constant 0 : i32
    %c0_i32_1 = arith.constant 0 : i32
    return %arg1, %c0_i32, %c0_i32_0 : i32, i32, i32
  }
  func.func @transform_7(%arg0: i32, %arg1: i32) -> (i32, i32, i32) {
    %c0_i32 = arith.constant 0 : i32
    %c0_i32_0 = arith.constant 0 : i32
    %c0_i32_1 = arith.constant 0 : i32
    return %arg1, %c0_i32, %c0_i32_0 : i32, i32, i32
  }
  func.func @transform_8(%arg0: i32, %arg1: i32) -> (i32, i32, i32) {
    %c0_i32 = arith.constant 0 : i32
    %c0_i32_0 = arith.constant 0 : i32
    %c0_i32_1 = arith.constant 0 : i32
    return %arg1, %c0_i32, %c0_i32_0 : i32, i32, i32
  }
  func.func @transform_9(%arg0: i32, %arg1: i32) -> (i32, i32, i32) {
    %c0_i32 = arith.constant 0 : i32
    %c0_i32_0 = arith.constant 0 : i32
    %c0_i32_1 = arith.constant 0 : i32
    return %arg1, %c0_i32, %c0_i32_0 : i32, i32, i32
  }
  func.func @transform_10(%arg0: i32, %arg1: i32) -> (i32, i32, i32) {
    %c0_i32 = arith.constant 0 : i32
    %c0_i32_0 = arith.constant 0 : i32
    %c0_i32_1 = arith.constant 0 : i32
    return %arg1, %c0_i32, %c0_i32_0 : i32, i32, i32
  }
  func.func @transform_11(%arg0: i32, %arg1: i32) -> (i32, i32, i32) {
    %c0_i32 = arith.constant 0 : i32
    %c0_i32_0 = arith.constant 0 : i32
    %c0_i32_1 = arith.constant 0 : i32
    return %arg1, %c0_i32, %c0_i32_0 : i32, i32, i32
  }
  func.func @transform_12(%arg0: i32, %arg1: i32) -> (i32, i32, i32) {
    %c0_i32 = arith.constant 0 : i32
    %c0_i32_0 = arith.constant 0 : i32
    %c0_i32_1 = arith.constant 0 : i32
    return %arg1, %c0_i32, %c0_i32_0 : i32, i32, i32
  }
  func.func @transform_13(%arg0: i32, %arg1: i32) -> (i32, i32, i32) {
    %c0_i32 = arith.constant 0 : i32
    %c0_i32_0 = arith.constant 0 : i32
    %c0_i32_1 = arith.constant 0 : i32
    return %arg1, %c0_i32, %c0_i32_0 : i32, i32, i32
  }
  func.func @transform_14(%arg0: i32, %arg1: i32) -> (i32, i32, i32) {
    %c0_i32 = arith.constant 0 : i32
    %c0_i32_0 = arith.constant 0 : i32
    %c0_i32_1 = arith.constant 0 : i32
    return %arg1, %c0_i32, %c0_i32_0 : i32, i32, i32
  }
  func.func @transform_15(%arg0: i32, %arg1: i32) -> (i32, i32, i32) {
    %c0_i32 = arith.constant 0 : i32
    %c0_i32_0 = arith.constant 0 : i32
    %c0_i32_1 = arith.constant 0 : i32
    return %arg1, %c0_i32, %c0_i32_0 : i32, i32, i32
  }
  func.func @transform_16(%arg0: i32, %arg1: i32) -> (i32, i32, i32) {
    %c0_i32 = arith.constant 0 : i32
    %c0_i32_0 = arith.constant 0 : i32
    %c0_i32_1 = arith.constant 0 : i32
    return %arg1, %c0_i32, %c0_i32_0 : i32, i32, i32
  }
  func.func @transform_17(%arg0: i32, %arg1: i32) -> (i32, i32, i32) {
    %c0_i32 = arith.constant 0 : i32
    %c0_i32_0 = arith.constant 0 : i32
    %c0_i32_1 = arith.constant 0 : i32
    return %arg1, %c0_i32, %c0_i32_0 : i32, i32, i32
  }
  func.func @transform_18(%arg0: i32, %arg1: i32) -> (i32, i32) {
    %c0_i32 = arith.constant 0 : i32
    %c0_i32_0 = arith.constant 0 : i32
    %c0_i32_1 = arith.constant 0 : i32
    return %c0_i32, %c0_i32_0 : i32, i32
  }
  func.func @transform_19(%arg0: i32, %arg1: i32) -> (i32, i32) {
    %c0_i32 = arith.constant 0 : i32
    %c0_i32_0 = arith.constant 0 : i32
    %c0_i32_1 = arith.constant 0 : i32
    return %c0_i32, %c0_i32_0 : i32, i32
  }
  func.func @transform_20(%arg0: i32, %arg1: i32) -> (i32, i32, i32) {
    %c0_i32 = arith.constant 0 : i32
    %c0_i32_0 = arith.constant 0 : i32
    %c0_i32_1 = arith.constant 0 : i32
    return %arg0, %c0_i32, %c0_i32_0 : i32, i32, i32
  }
  func.func @transform_21(%arg0: i32, %arg1: i32) -> (i32, i32) {
    %c0_i32 = arith.constant 0 : i32
    %c0_i32_0 = arith.constant 0 : i32
    %c0_i32_1 = arith.constant 0 : i32
    return %c0_i32, %c0_i32_0 : i32, i32
  }
  func.func @transform_22(%arg0: i32, %arg1: i32) -> (i32, i32) {
    %c0_i32 = arith.constant 0 : i32
    %c0_i32_0 = arith.constant 0 : i32
    %c0_i32_1 = arith.constant 0 : i32
    return %c0_i32, %c0_i32_0 : i32, i32
  }
  func.func @transform_23(%arg0: i32, %arg1: i32) -> (i32, i32) {
    %c0_i32 = arith.constant 0 : i32
    %c0_i32_0 = arith.constant 0 : i32
    %c0_i32_1 = arith.constant 0 : i32
    return %c0_i32, %c0_i32_0 : i32, i32
  }
  func.func @transform_24(%arg0: i32, %arg1: i32) -> (i32, i32) {
    %c0_i32 = arith.constant 0 : i32
    %c0_i32_0 = arith.constant 0 : i32
    %c0_i32_1 = arith.constant 0 : i32
    return %c0_i32, %c0_i32_0 : i32, i32
  }
  func.func @transform_25(%arg0: i32, %arg1: i32) -> (i32, i32) {
    %c0_i32 = arith.constant 0 : i32
    %c0_i32_0 = arith.constant 0 : i32
    %c0_i32_1 = arith.constant 0 : i32
    return %c0_i32, %c0_i32_0 : i32, i32
  }
  func.func @transform_26(%arg0: i32, %arg1: i32) -> (i32, i32, i32) {
    %c0_i32 = arith.constant 0 : i32
    %c0_i32_0 = arith.constant 0 : i32
    %c0_i32_1 = arith.constant 0 : i32
    return %arg0, %c0_i32, %c0_i32_0 : i32, i32, i32
  }
  func.func @transform_27(%arg0: i32, %arg1: i32) -> (i32, i32, i32) {
    %c0_i32 = arith.constant 0 : i32
    %c0_i32_0 = arith.constant 0 : i32
    %c0_i32_1 = arith.constant 0 : i32
    return %arg0, %c0_i32, %c0_i32_0 : i32, i32, i32
  }
}

</mosaic_0001>

<bundles_post_ra>
// kernel: tpu_custom_call.1
= control target key start
LH: loop header
LB: loop body
LE: loop exit
PB: predicated region body
PF: predicated region fallthrough
CT: control target
= control target key end

     0   :  { %s2979_s0 = inlined_call_operand.vmem [shape: f32[2,4,192], index: 0, kind: input, shape index: {}]   ;;  %s2980_s1 = inlined_call_operand.vmem [shape: f32[192,32], index: 1, kind: input, shape index: {}]   ;;  %s2981_s2 = inlined_call_operand.vmem [shape: f32[1,32], index: 2, kind: input, shape index: {}]   ;;  %s2982_s3 = inlined_call_operand.vmem [shape: f32[4,32], index: 3, kind: input, shape index: {}]   ;;  %s2983_s4 = inlined_call_operand.vmem [shape: f32[1,32], index: 4, kind: input, shape index: {}]   ;;  %s2984_s5 = inlined_call_operand.vmem [shape: f32[1,32], index: 5, kind: input, shape index: {}]   ;;  %s2985_s6 = inlined_call_operand.vmem [shape: f32[2,1,32], index: 6, kind: input, shape index: {}]   ;;  %s2986_s7 = inlined_call_operand.vmem [shape: f32[2,1,32], index: 7, kind: input, shape index: {}]   ;;  %s2987_s8 = inlined_call_operand.vmem [shape: f32[2,32,96], index: 8, kind: input, shape index: {}]   ;;  %s2988_s9 = inlined_call_operand.vmem [shape: f32[2,1,96], index: 9, kind: input, shape index: {}]   ;;  %s2989_s10 = inlined_call_operand.vmem [shape: f32[2,32,32], index: 10, kind: input, shape index: {}]   ;;  %s2990_s11 = inlined_call_operand.vmem [shape: f32[2,1,32], index: 11, kind: input, shape index: {}]   ;;  %s2991_s12 = inlined_call_operand.vmem [shape: f32[2,1,32], index: 12, kind: input, shape index: {}]   ;;  %s2992_s13 = inlined_call_operand.vmem [shape: f32[2,1,32], index: 13, kind: input, shape index: {}]   ;;  %s2993_s14 = inlined_call_operand.vmem [shape: f32[2,32,64], index: 14, kind: input, shape index: {}]   ;;  %s2994_s15 = inlined_call_operand.vmem [shape: f32[2,1,64], index: 15, kind: input, shape index: {}]   ;;  %s2995_s16 = inlined_call_operand.vmem [shape: f32[2,64,32], index: 16, kind: input, shape index: {}]   ;;  %s2996_s17 = inlined_call_operand.vmem [shape: f32[2,1,32], index: 17, kind: input, shape index: {}]   ;;  %s2997_s18 = inlined_call_operand.vmem [shape: f32[1,32], index: 18, kind: input, shape index: {}]   ;;  %s2998_s19 = inlined_call_operand.vmem [shape: f32[1,32], index: 19, kind: input, shape index: {}]   ;;  %s2999_s20 = inlined_call_operand.vmem [shape: f32[2,1,8], index: 20, kind: input, shape index: {}]   ;;  %s3000_s21 = inlined_call_operand.vmem [shape: f32[32,32], index: 21, kind: input, shape index: {}]   ;;  %s3001_s22 = inlined_call_operand.vmem [shape: f32[8,32], index: 22, kind: input, shape index: {}]   ;;  %s3002_s23 = inlined_call_operand.vmem [shape: f32[1,32], index: 23, kind: input, shape index: {}]   ;;  %s3003_s24 = inlined_call_operand.vmem [shape: f32[32,1], index: 24, kind: input, shape index: {}]   ;;  %s3004_s25 = inlined_call_operand.<no memory space> [shape: f32[1,1], index: 25, kind: input, shape index: {}]   ;;  %s3005_s26 = inlined_call_operand.vmem [shape: f32[2,1,1], index: 26, kind: output, shape index: {0}]   ;;  %s3006_s27 = inlined_call_operand.hbm [shape: f32[2,1,32], index: 27, kind: output, shape index: {1}]  }
   0x1   :  { %3025 = sst [smem:[#allocation20_spill]] %s2979_s0  ;;  %v33_v0 = vstv %s3004_s25 }
   0x2   :  { %3026 = sst [smem:[#allocation21_spill]] %s2980_s1  ;;  %34 = vst [vmem:[#allocation3] sm:$0x1] %v33_v0 }
   0x3   :  { %3027 = sst [smem:[#allocation22_spill]] %s2981_s2 }
   0x4   :  { %3028 = sst [smem:[#allocation23_spill]] %s2982_s3 }
   0x5   :  { %3029 = sst [smem:[#allocation24_spill]] %s2983_s4 }
   0x6   :  { %3030 = sst [smem:[#allocation25_spill]] %s2984_s5 }
   0x7   :  { %3031 = sst [smem:[#allocation26_spill]] %s2985_s6 }
   0x8   :  { %3032 = sst [smem:[#allocation27_spill]] %s2986_s7 }
   0x9   :  { %3033 = sst [smem:[#allocation28_spill]] %s2987_s8 }
   0xa   :  { %3034 = sst [smem:[#allocation29_spill]] %s2988_s9 }
   0xb   :  { %3035 = sst [smem:[#allocation30_spill]] %s2989_s10 }
   0xc   :  { %3036 = sst [smem:[#allocation31_spill]] %s2990_s11 }
   0xd   :  { %3037 = sst [smem:[#allocation32_spill]] %s2997_s18 }
   0xe   :  { %3038 = sst [smem:[#allocation33_spill]] %s2998_s19 }
   0xf   :  { %3039 = sst [smem:[#allocation34_spill]] %s2999_s20 }
  0x10   :  { %3040 = sst [smem:[#allocation35_spill]] %s3000_s21 }
  0x11   :  { %3041 = sst [smem:[#allocation36_spill]] %s3001_s22 }
  0x12   :  { %3042 = sst [smem:[#allocation37_spill]] %s3002_s23 }
  0x13   :  { %3043 = sst [smem:[#allocation38_spill]] %s3003_s24 }
  0x14   :  { %3044 = sst [smem:[#allocation39_spill]] %s3006_s27 }
  0x15   :  { %35 = vsyncpa [#allocation5], 0 }
  0x16   :  { %37 = vsyncpa [#allocation5 + $0x1], 0  ;;  %s2496_s8 = smov 0   ;;  %s2498_s30 = smov 0  }
  0x17   :  { %s2500_s9 = smov 0   ;;  %s2502_s5 = smov 0  }
  0x18   :  { %s2504_s28 = smov 0   ;;  %s2506_s0 = smov 0  }
  0x19   :  { %s2508_s10 = smov 0   ;;  %s2510_s29 = smov 0  }
  0x1a LB: > { %3045 = sst [smem:[#allocation7_spill]] %s2317_s8  ;;  %s2072_s25 = sadd.s32 4294967295, %s2345_s29   ;;  %s2345_s29 = sphi %s2510_s29, %s43_s29   ;;  %s2341_s10 = sphi %s2508_s10, %s3111_s10   ;;  %s2337_s0 = sphi %s2506_s0, %s3110_s0   ;;  %s2333_s28 = sphi %s2504_s28, %s3109_s28   ;;  %s2329_s5 = sphi %s2502_s5, %s3108_s5   ;;  %s2325_s9 = sphi %s2500_s9, %s3107_s9   ;;  %s2321_s30 = sphi %s2498_s30, %s3113_s30   ;;  %s2317_s8 = sphi %s2496_s8, %s3112_s8  }
  0x1b   : > { %3046 = sst [smem:[#allocation8_spill]] %s2325_s9  ;;  %s2073_s1 = sadd.s32 4294967294, %s2345_s29  }
  0x1c   : > { %3047 = sst [smem:[#allocation9_spill]] %s2333_s28  ;;  %s52_s6 = sadd.s32 1, %s2337_s0 }
  0x1d   : > { %3048 = sst [smem:[#allocation10_spill]] %s2337_s0  ;;  %p53_p0 = scmp.ge.s32.totalorder %s52_s6, 2 }
  0x1e   : > { %3049 = sst [smem:[#allocation11_spill]] %s2341_s10  ;;  %s55_s11 = sadd.s32 1, %s2341_s10 }
  0x1f   : > { %3050 = sst [smem:[#allocation12_spill]] %s2345_s29  ;;  %p714_p1 = scmp.ne.s32.totalorder %s2325_s9, %s2321_s30 }
  0x20   : > { %p715_p2 = scmp.eq.s32.totalorder %s2072_s25, 3  ;;  %s3115_s6 = smov (%p53_p0, %s52_s6), 0 }
  0x21   : > { %3051 = sst [smem:[#allocation13_spill]] %s3115_s6  ;;  %s3117_s11 = smov (!%p53_p0, %s55_s11), %s2341_s10 }
  0x22   : > { %p2545_p3 = por %p715_p2, %p714_p1  ;;  %p720_p4 = scmp.ne.s32.totalorder %s2321_s30, %s2317_s8 }
  0x23   : > { %p57_p5 = scmp.ge.s32.totalorder %s3117_s11, 2  ;;  %p721_p6 = scmp.eq.s32.totalorder %s2073_s1, 3 }
  0x24   : > { %s3052_s2 = scalar_select %p2545_p3, 1, 0 }
  0x25   : > { %p2076_p7 = scmp.ge.s32.totalorder %s2345_s29, 1  ;;  %p869_p8 = scmp.lt.s32.totalorder %s2345_s29, 5 }
  0x26   : > { %3053 = sst [smem:[#allocation14_spill]] %s3052_s2  ;;  %s3119_s11 = smov (%p57_p5, %s3117_s11), 0 }
  0x27   : > { %3054 = sst [smem:[#allocation15_spill]] %s3119_s11  ;;  %p2555_p9 = por %p721_p6, %p720_p4 }
  0x28   : > { %p870_p10 = pnand %p2076_p7, %p869_p8  ;;  %s701_s7 = ssub.s32 %s2341_s10, %s3119_s11 }
  0x29   : > { %s3055_s3 = scalar_select %p2555_p9, 1, 0 }
  0x2a   : > { %s704_s4 = sadd.s32 1, %s2325_s9  ;;  %p702_p11 = scmp.eq.s32.totalorder %s701_s7, 0 }
  0x2b   : > { %3056 = sst [smem:[#allocation16_spill]] %s3055_s3  ;;  %873 = sbr.rel (%p870_p10) target bundleno = 3199 (0xc7f), region = 124 }
  0x2c   : > { %s2563_s25 = scalar_select %p702_p11, %s2325_s9, %s704_s4  }
  0x2e   : > { %3057 = sst [smem:[#allocation17_spill]] %s2563_s25 }
  0x30   : > { %p990_p12 = scmp.lt.s32.totalorder %s2333_s28, 1  ;;  %p995_p13 = scmp.lt.s32.totalorder %s2329_s5, 1 }
  0x31   : > { %s3059_s9 = sld [smem:[#allocation20_spill]]  ;;  %p2087_p0 = scmp.ne.s32.totalorder %s2329_s5, 0 }
  0x32   : > { %s2569_s6 = scalar_select %p990_p12, %s2333_s28, 1 }
  0x33   : > { %s2572_s0 = scalar_select %p995_p13, %s2329_s5, 1 }
  0x34   : > { %s2120_s7 = sshll.u32 %s2569_s6, 3  ;;  %s3063_s1 = sld [smem:[#allocation28_spill]] }
  0x35   : > { %s2121_s18 = sshll.u32 %s2572_s0, 5  ;;  %s3065_s25 = sld [smem:[#allocation29_spill]] }
  0x36   : > { %s2622_s10 = scalar_lea.vmem %s2993_s14, %s2121_s18  ;;  %s3070_s22 = sld [smem:[#allocation22_spill]] (!%p2087_p0) }
  0x37   : > { %s2582_s3 = scalar_lea.vmem %s3059_s9, %s2120_s7  ;;  %s2124_s7 = sshll.u32 %s2572_s0, 6 }
  0x38   : > { %3060 = sst [smem:[#allocation18_spill]] %s2582_s3  ;;  %s2636_s19 = scalar_lea.vmem %s2995_s16, %s2124_s7 }
  0x39   : > { %s3066_s3 = sld [smem:[#allocation30_spill]] }
  0x3a   : > { %s2596_s4 = scalar_lea.vmem %s3063_s1, %s2121_s18  ;;  %s3073_s7 = sld [smem:[#allocation24_spill]] (!%p2087_p0) }
  0x3b   : > { %3064 = sst [smem:[#allocation19_spill]] %s2596_s4  ;;  %s1008_s9 = scalar_lea.vmem %s3065_s25, %s2572_s0 }
  0x3c   : > { %1048 = sbr.rel (%p2087_p0) target bundleno = 497 (0x1f1), region = 128  ;;  %s3069_s25 = sld [smem:[#allocation21_spill]] (!%p2087_p0) }
  0x3d   : > { %s3074_s28 = sld [smem:[#allocation25_spill]] (!%p2087_p0) }
  0x3f   : > { %s2605_s8 = scalar_lea.vmem %s3066_s3, %s2121_s18  ;;  %s3068_s18 = sand.u32 1, %s2321_s30  }
  0x40   : > { %s2644_s11 = scalar_lea.vmem [#allocation4], %s3068_s18  ;;  %s3071_s18 = sld [smem:[#allocation18_spill]] (!%p2087_p0) }
  0x41   : > { %vm1126_vm0 = vcmask 253952   ;;  %v2659_v4 = vld [vmem:[%s3070_s22] sm:$0x1]  ;;  %vm1080_vm1 = vcmask 523264   ;;  %v2347_v30 = vmov 32.0   ;;  %vm1161_vm3 = vcmask 257024  }
  0x42   : > { %v1065_v1 = vld [vmem:[%s3069_s25 + $0x78] sm:$0xff]  ;;  %v1064_v2 = vld [vmem:[%s3069_s25 + $0x70] sm:$0xff]  ;;  %v1063_v3 = vld [vmem:[%s3069_s25 + $0x68] sm:$0xff]  ;;  %v1127_v5 = vsel %vm1126_vm0, %v2659_v4, 0.0  ;;  %2204 = vrcp.f32 %v2347_v30 }
  0x43   : > { %1083 = vmatpush.msra.mxu0 %v1065_v1  ;;  %v1073_v6 = vld [vmem:[%s3069_s25 + $0xb8] sm:$0xff]  ;;  %v1062_v7 = vld [vmem:[%s3069_s25 + $0x60] sm:$0xff]  ;;  %1128 = vadd.xlane.f32.xlu0 %v1127_v5  ;;  %v1072_v8 = vld [vmem:[%s3069_s25 + $0xb0] sm:$0xff]  ;;  %s3075_s21 = smov %s3074_s28 }
  0x44   : > { %1111 = vmatpush.msra.mxu1 %v1073_v6  ;;  %v1071_v9 = vld [vmem:[%s3069_s25 + $0xa8] sm:$0xff]  ;;  %v1061_v10 = vld [vmem:[%s3069_s25 + $0x58] sm:$0xff]  ;;  %v1070_v11 = vld [vmem:[%s3069_s25 + $0xa0] sm:$0xff] }
  0x45   : > { %1084 = vmatpush.msra.mxu0 %v1064_v2  ;;  %v1060_v12 = vld [vmem:[%s3069_s25 + $0x50] sm:$0xff]  ;;  %v1069_v14 = vld [vmem:[%s3069_s25 + $0x98] sm:$0xff]  ;;  %v1059_v15 = vld [vmem:[%s3069_s25 + $0x48] sm:$0xff] }
  0x46   : > { %1112 = vmatpush.msra.mxu1 %v1072_v8  ;;  %v1049_v13 = vld [vmem:[%s3071_s18] sm:$0xff]  ;;  %v1068_v16 = vld [vmem:[%s3069_s25 + $0x90] sm:$0xff]  ;;  %v1067_v18 = vld [vmem:[%s3069_s25 + $0x88] sm:$0xff]  ;;  %s3072_s18 = sld [smem:[#allocation23_spill]] }
  0x47   : > { %1085 = vmatpush.msra.mxu0 %v1063_v3  ;;  %1076 = vst [vmem:[#allocation1] ss:$2 sm:$0xff] %v1049_v13  ;;  %v1058_v17 = vld [vmem:[%s3069_s25 + $0x40] sm:$0xff]  ;;  %v1057_v19 = vld [vmem:[%s3069_s25 + $0x38] sm:$0xff]  ;;  %v1056_v21 = vld [vmem:[%s3069_s25 + $0x30] sm:$0xff] }
  0x48   : > { %1113 = vmatpush.msra.mxu1 %v1071_v9  ;;  %v1066_v20 = vld [vmem:[%s3069_s25 + $0x80] sm:$0xff]  ;;  %v1055_v23 = vld [vmem:[%s3069_s25 + $0x28] sm:$0xff]  ;;  %v1053_v25 = vld [vmem:[%s3069_s25 + $0x18] sm:$0xff]  ;;  %v2205_v31 = vpop.eup %2204 }
  0x49   : > { %1086 = vmatpush.msra.mxu0 %v1062_v7  ;;  %v1054_v24 = vld [vmem:[%s3069_s25 + $0x20] sm:$0xff]  ;;  %v1052_v26 = vld [vmem:[%s3069_s25 + $0x10] sm:$0xff]  ;;  %v1051_v27 = vld [vmem:[%s3069_s25 + $0x8] sm:$0xff]  ;;  %v1131_v32 = vmul.f32 32.0, %v2205_v31  ;;  %vm1135_vm2 = vweird.f32 %v2205_v31 }
  0x4a   : > { %1114 = vmatpush.msra.mxu1 %v1070_v11  ;;  %v1050_v28 = vld [vmem:[%s3069_s25] sm:$0xff] }
  0x4b   : > { %1087 = vmatpush.msra.mxu0 %v1061_v10  ;;  %v1132_v33 = vsub.f32 1.0, %v1131_v32  ;;  %v1124_v57 = vld [vmem:[%s3073_s7] sm:$0x1] }
  0x4c   : > { %1115 = vmatpush.msra.mxu1 %v1069_v14  ;;  %v1074_v42 = vld [vmem:[%s3072_s18] sm:$0xf] }
  0x4d   : > { %1088 = vmatpush.msra.mxu0 %v1060_v12  ;;  %v1133_v34 = vmul.f32 %v2205_v31, %v1132_v33  ;;  %v1125_v60 = vld [vmem:[%s3074_s28] sm:$0x1] }
  0x4e   : > { %1116 = vmatpush.msra.mxu1 %v1068_v16  ;;  %v1078_v22 = vld.sshfl [vmem:[#allocation1 + $0x8] sm:$0xff pattern:$0x75316420]  ;;  %v1077_v29 = vld.sshfl [vmem:[#allocation1] sm:$0xff pattern:$0x75316420] }
  0x4f   : > { %1089 = vmatpush.msra.mxu0 %v1059_v15  ;;  %v1134_v35 = vadd.f32 %v2205_v31, %v1133_v34  ;;  %v2202_v13 = vld [vmem:[%s3073_s7] ss:$0 sm:$0xff] }
  0x50   : > { %1117 = vmatpush.msra.mxu1 %v1067_v18  ;;  %v2203_v15 = vld [vmem:[%s3075_s21] ss:$0 sm:$0xff] }
  0x51   : > { %1090 = vmatpush.msra.mxu0 %v1058_v17  ;;  %v1136_v36 = vsel %vm1135_vm2, %v2205_v31, %v1134_v35 }
  0x52   : > { %1118 = vmatpush.msra.mxu1 %v1066_v20 }
  0x53   : > { %1091 = vmatpush.msra.mxu0 %v1057_v19  ;;  %2088 = vmatmul.msk.f32.vlgmr.msra.gmra.mxu1 %vm1080_vm1, %v1078_v22 }
  0x55   : > { %1092 = vmatpush.msra.mxu0 %v1056_v21 }
  0x57   : > { %1093 = vmatpush.msra.mxu0 %v1055_v23 }
  0x59   : > { %1094 = vmatpush.msra.mxu0 %v1054_v24 }
  0x5b   : > { %1095 = vmatpush.msra.mxu0 %v1053_v25 }
  0x5d   : > { %1096 = vmatpush.msra.mxu0 %v1052_v26 }
  0x5f   : > { %1097 = vmatpush.msra.mxu0 %v1051_v27 }
  0x61   : > { %1098 = vmatpush.msra.mxu0 %v1050_v28 }
  0x62   : > { %1099 = vmatmul.f32.vlgmr.msra.gmra.mxu0 %v1077_v29 }
  0xb6   : > { %v1129_v37 = vpop.xlane.xlu0 %1128 }
  0xb7   : > { %v1137_v38 = vmul.f32 %v1136_v36, %v1129_v37 }
  0xb9   : > { %v1138_v39 = vsub.f32 %v2659_v4, %v1137_v38 }
  0xbb   : > { %v1139_v40 = vmul.f32 %v1138_v39, %v1138_v39 }
  0xbd   : > { %v1140_v41 = vsel %vm1126_vm0, %v1139_v40, 0.0 }
  0xbe   : > { %1141 = vadd.xlane.f32.xlu1 %v1140_v41 }
  0xd0   : > { %v1120_v44 = vpop.f32.mrf.mxu1 }
  0xdf   : > { %v1100_v43 = vpop.f32.mrf.mxu0 }
  0xe0   : > { %v1101_v45 = vadd.f32 %v1100_v43, %v1074_v42 }
  0xe2   : > { %v1121_v46 = vadd.f32 %v1120_v44, %v1101_v45 }
  0xe4   : > { %v1162_v47 = vsel %vm1161_vm3, %v1121_v46, 0.0 }
  0xe5   : > { %1163 = vadd.xlane.f32.xlu0 %v1162_v47 }
 0x131   : > { %v1142_v48 = vpop.xlane.xlu1 %1141 }
 0x132   : > { %v1143_v49 = vmul.f32 %v1142_v48, %v1136_v36 }
 0x134   : > { %v1144_v50 = vadd.f32 1e-05, %v1143_v49 }
 0x136   : > { %2206 = vrsqrt.f32 %v1144_v50  ;;  %vm1151_vm4 = vweird.f32 %v1144_v50 }
 0x13c   : > { %v2207_v51 = vpop.eup %2206 }
 0x13d   : > { %v1146_v52 = vmul.f32 %v2207_v51, %v1144_v50  ;;  %vm1152_vm5 = vweird.f32 %v2207_v51 }
 0x13e   : > { %vm1153_vm6 = vmor %vm1151_vm4, %vm1152_vm5 }
 0x13f   : > { %v1147_v53 = vmul.f32 %v2207_v51, %v1146_v52 }
 0x141   : > { %v1148_v54 = vmul.f32 0.5, %v1147_v53 }
 0x143   : > { %v1149_v55 = vsub.f32 1.5, %v1148_v54 }
 0x145   : > { %v1150_v56 = vmul.f32 %v2207_v51, %v1149_v55 }
 0x147   : > { %v1154_v58 = vsel %vm1153_vm6, %v2207_v51, %v1150_v56 }
 0x148   : > { %v1155_v59 = vmul.f32 %v1154_v58, %v1138_v39 }
 0x14a   : > { %v1156_v61 = vmul.f32 %v1155_v59, %v1124_v57 }
 0x14c   : > { %v1157_v62 = vadd.f32 %v1156_v61, %v1125_v60 }
 0x14e   : > { %1158 = vst.msk [vmem:[#allocation2] sm:$0x1] %vm1126_vm0, %v1157_v62 }
 0x158   : > { %v1164_v63 = vpop.xlane.xlu0 %1163 }
 0x159   : > { %v1165_v0 = vmul.f32 %v1164_v63, %v1136_v36 }
 0x15b   : > { %v1166_v1 = vsub.f32 %v1121_v46, %v1165_v0 }
 0x15d   : > { %v1167_v2 = vmul.f32 %v1166_v1, %v1166_v1 }
 0x15f   : > { %v1168_v3 = vsel %vm1161_vm3, %v1167_v2, 0.0 }
 0x160   : > { %1169 = vadd.xlane.f32.xlu1 %v1168_v3 }
 0x1d3   : > { %v1170_v4 = vpop.xlane.xlu1 %1169 }
 0x1d4   : > { %v1171_v5 = vmul.f32 %v1170_v4, %v1136_v36 }
 0x1d6   : > { %v1172_v6 = vadd.f32 1e-05, %v1171_v5 }
 0x1d8   : > { %2208 = vrsqrt.f32 %v1172_v6  ;;  %vm1179_vm8 = vweird.f32 %v1172_v6 }
 0x1de   : > { %v2209_v7 = vpop.eup %2208 }
 0x1df   : > { %v1174_v8 = vmul.f32 %v2209_v7, %v1172_v6  ;;  %vm1180_vm7 = vweird.f32 %v2209_v7 }
 0x1e0   : > { %vm1181_vm9 = vmor %vm1179_vm8, %vm1180_vm7 }
 0x1e1   : > { %v1175_v9 = vmul.f32 %v2209_v7, %v1174_v8 }
 0x1e3   : > { %v1176_v10 = vmul.f32 0.5, %v1175_v9 }
 0x1e5   : > { %v1177_v11 = vsub.f32 1.5, %v1176_v10 }
 0x1e7   : > { %v1178_v12 = vmul.f32 %v2209_v7, %v1177_v11 }
 0x1e9   : > { %v1182_v14 = vsel %vm1181_vm9, %v2209_v7, %v1178_v12 }
 0x1ea   : > { %v1183_v16 = vmul.f32 %v1182_v14, %v1166_v1 }
 0x1ec   : > { %v1187_v17 = vmul.f32 %v2202_v13, %v1183_v16 }
 0x1ee   : > { %v1191_v18 = vadd.f32 %v2203_v15, %v1187_v17 }
 0x1f0   : > { %1192 = vst.msk [vmem:[#allocation2 + $0x1] sm:$0xf] %vm1161_vm3, %v1191_v18 }
 0x1f1 PF: > { %vm1196_vm10 = vcmask 258048   ;;  %s3076_s29 = sld [smem:[#allocation19_spill]]  ;;  %v2348_v21 = vmov 32.0   ;;  %v1267_v37 = vlaneseq  ;;  %v2349_v41 = vmov 0.0   ;;  %s2350_s27 = smov 32  }
 0x1f2   : > { %2223 = vrcp.f32 %v2348_v21  ;;  %s3077_s28 = sld [smem:[#allocation26_spill]]  ;;  %vm1242_vm3 = vcmask 261120   ;;  %v2217_v59 = vld [vmem:[%s1008_s9] ss:$0 sm:$0xff]  ;;  %s2351_s24 = smov 96   ;;  %vm1307_vm7 = vcmask 36864  }
 0x1f3   : > { %v1268_v38 = vand.u32 127, %v1267_v37  ;;  %s3079_s18 = sld [smem:[#allocation27_spill]]  ;;  %s2352_s9 = smov 64  }
 0x1f4   : > { %s3082_s2 = sld [smem:[#allocation31_spill]]  ;;  %s3084_s4 = scalar_lea.vmem %s2991_s12, %s2572_s0 }
 0x1f5   : > { %vm1270_vm12 = vcmp.lt.s32.totalorder %v1268_v38, 8  ;;  %vm1351_vm13 = vcmp.ge.s32.totalorder %v1268_v38, 8  ;;  %vm1352_vm14 = vcmp.lt.s32.totalorder %v1268_v38, 16  ;;  %vm1493_vm4 = vcmp.ge.s32.totalorder %v1268_v38, 24  ;;  %s3085_s20 = scalar_lea.vmem %s2992_s13, %s2572_s0  ;;  %p2114_p1 = scmp.ne.s32.totalorder %s2329_s5, 1 }
 0x1f6   : > { %v2762_v42 = vsel %vm1270_vm12, 1.0, %v2349_v41  ;;  %vm1353_vm15 = vmand %vm1351_vm13, %vm1352_vm14  ;;  %vm1494_vm5 = vcmp.lt.s32.totalorder %v1268_v38, 32  ;;  %vm1422_vm8 = vcmp.ge.s32.totalorder %v1268_v38, 16  ;;  %vm1423_vm9 = vcmp.lt.s32.totalorder %v1268_v38, 24  ;;  %s3088_s1 = sld [smem:[#allocation35_spill]] (!%p2114_p1)  ;;  %s3097_s5 = scalar_lea.vmem (!%p2114_p1), %s3005_s26, %s2569_s6 }
 0x1f7   : > { %v2748_v19 = vld [vmem:[#allocation2] sm:$0x1f]  ;;  %v1237_v33 = vld [vmem:[%s3076_s29 + $0x18] sm:$0xff]  ;;  %v1236_v34 = vld [vmem:[%s3076_s29 + $0x10] sm:$0xff]  ;;  %v2764_v44 = vsel %vm1353_vm15, 1.0, %v2349_v41  ;;  %vm1326_vm12 = vcmask 1044480  }
 0x1f8   : > { %v1197_v20 = vsel %vm1196_vm10, %v2748_v19, 0.0  ;;  %v2224_v22 = vpop.eup %2223  ;;  %1258 = vmatpush.msra.mxu0 %v1237_v33  ;;  %v1235_v35 = vld [vmem:[%s3076_s29 + $0x8] sm:$0xff]  ;;  %v1234_v36 = vld [vmem:[%s3076_s29] sm:$0xff]  ;;  %v2210_v45 = vpack.i.bf16 %v2764_v44, %v2762_v42  ;;  %s3078_s22 = scalar_lea.vmem %s3077_s28, %s2572_s0  ;;  %vm1495_vm6 = vmand %vm1493_vm4, %vm1494_vm5  ;;  %vm1322_vm13 = vcmask 39936  }
 0x1f9   : > { %1198 = vadd.xlane.f32.xlu0 %v1197_v20  ;;  %v1201_v23 = vmul.f32 32.0, %v2224_v22  ;;  %vm1205_vm11 = vweird.f32 %v2224_v22  ;;  %v2215_v52 = vld [vmem:[%s3078_s22] ss:$0 sm:$0xff]  ;;  %s3080_s29 = scalar_lea.vmem %s3079_s18, %s2572_s0  ;;  %v2787_v2 = vsel %vm1495_vm6, 1.0, %v2349_v41  ;;  %vm1692_vm6 = vcmask 523264   ;;  %s3090_s22 = sld [smem:[#allocation34_spill]] (!%p2114_p1) }
 0x1fa   : > { %1259 = vmatpush.msra.mxu0 %v1236_v34  ;;  %2211 = vrot.lane.b32.xlu1 %v2210_v45, %s2350_s27  ;;  %v2216_v55 = vld [vmem:[%s3080_s29] ss:$0 sm:$0xff]  ;;  %s3086_s29 = scalar_lea.vmem %s2994_s15, %s2572_s0 }
 0x1fb   : > { %v1202_v24 = vsub.f32 1.0, %v1201_v23 }
 0x1fc   : > { %1260 = vmatpush.msra.mxu0 %v1235_v35 }
 0x1fd   : > { %v1203_v25 = vmul.f32 %v2224_v22, %v1202_v24 }
 0x1fe   : > { %1261 = vmatpush.msra.mxu0 %v1234_v36 }
 0x1ff   : > { %v1204_v26 = vadd.f32 %v2224_v22, %v1203_v25 }
 0x201   : > { %v2752_v27 = vsel %vm1205_vm11, %v2224_v22, %v1204_v26  ;;  %vm1424_vm11 = vmand %vm1422_vm8, %vm1423_vm9 }
 0x202   : > { %v2797_v10 = vsel %vm1424_vm11, 1.0, %v2349_v41 }
 0x26c   : > { %v1199_v28 = vpop.xlane.xlu0 %1198  ;;  %v2212_v58 = vpop.permute.xlu1 %2211 }
 0x26d   : > { %v1207_v29 = vmul.f32 %v2752_v27, %v1199_v28  ;;  %v2214_v60 = vunpack.i.h.bf16 %v2212_v58  ;;  %v2213_v61 = vunpack.i.l.bf16 %v2212_v58 }
 0x26f   : > { %v1208_v30 = vsub.f32 %v2748_v19, %v1207_v29 }
 0x271   : > { %v1209_v31 = vmul.f32 %v1208_v30, %v1208_v30 }
 0x273   : > { %v1210_v32 = vsel %vm1196_vm10, %v1209_v31, 0.0 }
 0x274   : > { %1211 = vadd.xlane.f32.xlu0 %v1210_v32 }
 0x2e7   : > { %v1212_v39 = vpop.xlane.xlu0 %1211 }
 0x2e8   : > { %v1213_v40 = vmul.f32 %v1212_v39, %v2752_v27 }
 0x2ea   : > { %v1214_v43 = vadd.f32 1e-05, %v1213_v40 }
 0x2ec   : > { %2225 = vrsqrt.f32 %v1214_v43  ;;  %vm1221_vm1 = vweird.f32 %v1214_v43 }
 0x2f2   : > { %v2226_v46 = vpop.eup %2225 }
 0x2f3   : > { %v1216_v47 = vmul.f32 %v2226_v46, %v1214_v43  ;;  %vm1222_vm0 = vweird.f32 %v2226_v46 }
 0x2f4   : > { %vm1223_vm2 = vmor %vm1221_vm1, %vm1222_vm0 }
 0x2f5   : > { %v1217_v48 = vmul.f32 %v2226_v46, %v1216_v47 }
 0x2f7   : > { %v1218_v49 = vmul.f32 0.5, %v1217_v48 }
 0x2f9   : > { %v1219_v50 = vsub.f32 1.5, %v1218_v49 }
 0x2fb   : > { %v1220_v51 = vmul.f32 %v2226_v46, %v1219_v50 }
 0x2fd   : > { %v1224_v53 = vsel %vm1223_vm2, %v2226_v46, %v1220_v51 }
 0x2fe   : > { %v1225_v54 = vmul.f32 %v1224_v53, %v1208_v30 }
 0x300   : > { %v1229_v56 = vmul.f32 %v2215_v52, %v1225_v54 }
 0x302   : > { %v1233_v57 = vadd.f32 %v2216_v55, %v1229_v56 }
 0x304   : > { %2089 = vmatmul.msk.f32.vlgmr.msra.gmra.mxu0 %vm1242_vm3, %v1233_v57 }
 0x381   : > { %v1263_v62 = vpop.f32.mrf.mxu0 }
 0x382   : > { %v1264_v63 = vadd.f32 %v2217_v59, %v1263_v62  ;;  %v1566_v62 = vld [vmem:[%s2605_s8 + $0x10] sm:$0xff] }
 0x384   : > { %v1360_v0 = vmul.f32 %v2214_v60, %v1264_v63  ;;  %v1278_v1 = vmul.f32 %v2213_v61, %v1264_v63  ;;  %v1266_v4 = vmul.f32 0.35355338, %v1264_v63  ;;  %v1567_v61 = vld [vmem:[%s2605_s8 + $0x18] sm:$0xff] }
 0x386   : > { %1362 = vrot.lane.b32.xlu2 %v1360_v0, %s2351_s24  ;;  %1280 = vrot.lane.b32.xlu1 %v1278_v1, %s2351_s24  ;;  %v1564_v0 = vld [vmem:[%s2605_s8] sm:$0xff] }
 0x38e   : > { %1499 = vrot.lane.b32.xlu1 %v2787_v2, %s2350_s27 }
 0x3e0   : > { %v1363_v3 = vpop.permute.xlu2 %1362 }
 0x3e1   : > { %2096 = vmatpush.xpose.msk.msra.mxu3 %vm1242_vm3, %v1363_v3 }
 0x3e4   : > { %2097 = vmatmul.msk.f32.vlgmr.msra.gmra.mxu3 %vm1242_vm3, %v1266_v4 }
 0x3f8   : > { %v1281_v5 = vpop.permute.xlu1 %1280 }
 0x3f9   : > { %2091 = vmatpush.xpose.msk.msra.mxu1 %vm1242_vm3, %v1281_v5 }
 0x3fc   : > { %2092 = vmatmul.msk.f32.vlgmr.msra.gmra.mxu1 %vm1242_vm3, %v1266_v4 }
 0x400   : > { %v1500_v25 = vpop.permute.xlu1 %1499 }
 0x401   : > { %v1502_v26 = vmul.f32 %v1500_v25, %v1264_v63 }
 0x467   : > { %v1383_v6 = vpop.f32.mrf.mxu3 }
 0x468   : > { %v1386_v7 = vsel %vm1307_vm7, %v1383_v6, -inf }
 0x469   : > { %1387 = vmax.xlane.f32.xlu0 %v1386_v7 }
 0x479   : > { %v1304_v8 = vpop.f32.mrf.mxu1 }
 0x47a   : > { %v1308_v9 = vsel %vm1307_vm7, %v1304_v8, -inf }
 0x47b   : > { %1309 = vmax.xlane.f32.xlu2 %v1308_v9 }
 0x47d   : > { %1428 = vrot.lane.b32.xlu0 %v2797_v10, %s2350_s27  ;;  %s3083_s27 = scalar_lea.vmem %s3082_s2, %s2572_s0  ;;  %s3093_s2 = sld [smem:[#allocation33_spill]] (!%p2114_p1) }
 0x493   : > { %1320 = vrot.lane.b32.xlu2 %v1264_v63, %s2352_s9  ;;  %s3087_s9 = scalar_lea.vmem %s2996_s17, %s2572_s0  ;;  %s3092_s0 = sld [smem:[#allocation32_spill]] (!%p2114_p1) }
 0x4dc   : > { %v1388_v11 = vpop.xlane.xlu0 %1387 }
 0x4dd   : > { %v1389_v12 = vsub.f32 %v1383_v6, %v1388_v11 }
 0x4df   : > { %v1390_v13 = vmul.f32 1.442695, %v1389_v12 }
 0x4e1   : > { %2227 = vpow2.f32 %v1390_v13 }
 0x4e7   : > { %v2228_v14 = vpop.eup %2227 }
 0x4e8   : > { %v1392_v15 = vsel %vm1307_vm7, %v2228_v14, 0.0 }
 0x4e9   : > { %1393 = vadd.xlane.f32.xlu0 %v1392_v15 }
 0x4ee   : > { %v1310_v16 = vpop.xlane.xlu2 %1309 }
 0x4ef   : > { %v1311_v17 = vsub.f32 %v1304_v8, %v1310_v16  ;;  %v1429_v18 = vpop.permute.xlu0 %1428  ;;  %v2218_v8 = vld [vmem:[%s3083_s27] ss:$0 sm:$0xff] }
 0x4f0   : > { %v1431_v20 = vmul.f32 %v1429_v18, %v1264_v63  ;;  %v1565_v63 = vld [vmem:[%s2605_s8 + $0x8] sm:$0xff]  ;;  %v1630_v18 = vld [vmem:[%s2622_s10 + $0x10] sm:$0xff] }
 0x4f1   : > { %v1312_v21 = vmul.f32 1.442695, %v1311_v17  ;;  %v1631_v17 = vld [vmem:[%s2622_s10 + $0x18] sm:$0xff] }
 0x4f2   : > { %1433 = vrot.lane.b32.xlu2 %v1431_v20, %s2351_s24  ;;  %v1629_v20 = vld [vmem:[%s2622_s10 + $0x8] sm:$0xff] }
 0x4f3   : > { %2229 = vpow2.f32 %v1312_v21 }
 0x4f6   : > { %v1321_v22 = vpop.permute.xlu2 %1320 }
 0x4f7   : > { %2093 = vmatpush.msk.msra.mxu2 %vm1326_vm12, %v1321_v22  ;;  %2103 = vmatpush.msk.msrb.mxu3 %vm1326_vm12, %v1321_v22 }
 0x4f9   : > { %2098 = vmatpush.msk.msrb.mxu2 %vm1326_vm12, %v1321_v22  ;;  %v2230_v23 = vpop.eup %2229  ;;  %1651 = vmatpush.msra.mxu3 %v1631_v17 }
 0x4fa   : > { %v1314_v24 = vsel %vm1307_vm7, %v2230_v23, 0.0 }
 0x4fb   : > { %1315 = vadd.xlane.f32.xlu1 %v1314_v24  ;;  %1652 = vmatpush.msra.mxu3 %v1630_v18 }
 0x4fd   : > { %1653 = vmatpush.msra.mxu3 %v1629_v20 }
 0x514   : > { %1504 = vrot.lane.b32.xlu1 %v1502_v26, %s2351_s24 }
 0x54c   : > { %v1434_v28 = vpop.permute.xlu2 %1433 }
 0x54d   : > { %2101 = vmatpush.xpose.msk.msrb.mxu1 %vm1242_vm3, %v1434_v28 }
 0x550   : > { %2102 = vmatmul.msk.f32.vlgmr.msrb.gmra.mxu1 %vm1242_vm3, %v1266_v4 }
 0x551   : > { %1587 = vmatpush.msra.mxu1 %v1567_v61 }
 0x553   : > { %1588 = vmatpush.msra.mxu1 %v1566_v62 }
 0x555   : > { %1589 = vmatpush.msra.mxu1 %v1565_v63  ;;  %v2222_v63 = vld [vmem:[%s3087_s9] ss:$0 sm:$0xff]  ;;  %s3096_s9 = sld [smem:[#allocation37_spill]] (!%p2114_p1) }
 0x557   : > { %1590 = vmatpush.msra.mxu1 %v1564_v0 }
 0x55c   : > { %v1394_v30 = vpop.xlane.xlu0 %1393 }
 0x56e   : > { %v1316_v29 = vpop.xlane.xlu1 %1315 }
 0x56f   : > { %2231 = vrcp.f32 %v1316_v29 }
 0x570   : > { %2233 = vrcp.f32 %v1394_v30 }
 0x575   : > { %v2232_v31 = vpop.eup %2231 }
 0x576   : > { %v1318_v32 = vmul.f32 %v2232_v31, %v2230_v23  ;;  %v2234_v33 = vpop.eup %2233  ;;  %v2219_v31 = vld [vmem:[%s3084_s4] ss:$0 sm:$0xff] }
 0x577   : > { %v1396_v34 = vmul.f32 %v2234_v33, %v2228_v14 }
 0x578   : > { %2094 = vmatmul.msk.f32.vlgmr.msra.gmra.mxu2 %vm1322_vm13, %v1318_v32 }
 0x580   : > { %2099 = vmatmul.msk.f32.vlgmr.msrb.gmra.mxu2 %vm1322_vm13, %v1396_v34  ;;  %v2220_v34 = vld [vmem:[%s3085_s20] ss:$0 sm:$0xff]  ;;  %s3091_s20 = scalar_lea.vmem (!%p2114_p1), %s3090_s22, %s2569_s6 }
 0x586   : > { %v1505_v35 = vpop.permute.xlu1 %1504 }
 0x587   : > { %2106 = vmatpush.xpose.msk.msra.mxu2 %vm1242_vm3, %v1505_v35 }
 0x58a   : > { %2107 = vmatmul.msk.f32.vlgmr.msra.gmra.mxu2 %vm1242_vm3, %v1266_v4 }
 0x58b   : > { %2108 = vmatpush.msk.msrb.mxu2 %vm1326_vm12, %v1321_v22 }
 0x5cd   : > { %v1454_v36 = vpop.f32.mrf.mxu1 }
 0x5ce   : > { %v1457_v37 = vsel %vm1307_vm7, %v1454_v36, -inf }
 0x5cf   : > { %1458 = vmax.xlane.f32.xlu2 %v1457_v37  ;;  %v1687_v37 = vld [vmem:[%s2636_s19 + $0x38] sm:$0xff] }
 0x5d0   : > { %1704 = vmatpush.msrb.mxu0 %v1687_v37 }
 0x5fb   : > { %v1346_v38 = vpop.f32.mrf.mxu2 }
 0x5fc   : > { %v1349_v40 = vmul.f32 %v2762_v42, %v1346_v38  ;;  %v1686_v38 = vld [vmem:[%s2636_s19 + $0x30] sm:$0xff] }
 0x5fd   : > { %1705 = vmatpush.msrb.mxu0 %v1686_v38 }
 0x603   : > { %v1417_v39 = vpop.f32.mrf.mxu2 }
 0x604   : > { %v1420_v41 = vmul.f32 %v2764_v44, %v1417_v39  ;;  %v1685_v39 = vld [vmem:[%s2636_s19 + $0x28] sm:$0xff] }
 0x605   : > { %1706 = vmatpush.msrb.mxu0 %v1685_v39 }
 0x606   : > { %v1421_v43 = vadd.f32 %v1420_v41, %v1349_v40  ;;  %v1684_v40 = vld [vmem:[%s2636_s19 + $0x20] sm:$0xff]  ;;  %v1683_v41 = vld [vmem:[%s2636_s19 + $0x18] sm:$0xff] }
 0x607   : > { %1707 = vmatpush.msrb.mxu0 %v1684_v40 }
 0x609   : > { %1708 = vmatpush.msrb.mxu0 %v1683_v41 }
 0x60d   : > { %v1525_v45 = vpop.f32.mrf.mxu2 }
 0x60e   : > { %v1528_v46 = vsel %vm1307_vm7, %v1525_v45, -inf }
 0x60f   : > { %1529 = vmax.xlane.f32.xlu0 %v1528_v46  ;;  %v1681_v46 = vld [vmem:[%s2636_s19 + $0x8] sm:$0xff] }
 0x642   : > { %v1459_v47 = vpop.xlane.xlu2 %1458 }
 0x643   : > { %v1460_v48 = vsub.f32 %v1454_v36, %v1459_v47 }
 0x645   : > { %v1461_v49 = vmul.f32 1.442695, %v1460_v48 }
 0x647   : > { %2235 = vpow2.f32 %v1461_v49  ;;  %v1680_v49 = vld [vmem:[%s2636_s19] sm:$0xff] }
 0x64d   : > { %v2236_v50 = vpop.eup %2235 }
 0x64e   : > { %v1463_v51 = vsel %vm1307_vm7, %v2236_v50, 0.0 }
 0x64f   : > { %1464 = vadd.xlane.f32.xlu1 %v1463_v51 }
 0x682   : > { %v1530_v52 = vpop.xlane.xlu0 %1529 }
 0x683   : > { %v1531_v53 = vsub.f32 %v1525_v45, %v1530_v52  ;;  %v1682_v45 = vld [vmem:[%s2636_s19 + $0x10] sm:$0xff] }
 0x684   : > { %1709 = vmatpush.msrb.mxu0 %v1682_v45 }
 0x685   : > { %v1532_v54 = vmul.f32 1.442695, %v1531_v53 }
 0x686   : > { %1710 = vmatpush.msrb.mxu0 %v1681_v46 }
 0x687   : > { %2237 = vpow2.f32 %v1532_v54 }
 0x688   : > { %1711 = vmatpush.msrb.mxu0 %v1680_v49 }
 0x68d   : > { %v2238_v42 = vpop.eup %2237 }
 0x68e   : > { %v1534_v44 = vsel %vm1307_vm7, %v2238_v42, 0.0 }
 0x68f   : > { %1535 = vadd.xlane.f32.xlu0 %v1534_v44 }
 0x6c2   : > { %v1465_v55 = vpop.xlane.xlu1 %1464 }
 0x6c3   : > { %2239 = vrcp.f32 %v1465_v55 }
 0x6c9   : > { %v2240_v56 = vpop.eup %2239 }
 0x6ca   : > { %v1467_v57 = vmul.f32 %v2240_v56, %v2236_v50 }
 0x6cc   : > { %2104 = vmatmul.msk.f32.vlgmr.msrb.gmra.mxu3 %vm1322_vm13, %v1467_v57 }
 0x702   : > { %v1536_v58 = vpop.xlane.xlu0 %1535 }
 0x703   : > { %2241 = vrcp.f32 %v1536_v58 }
 0x709   : > { %v2242_v59 = vpop.eup %2241 }
 0x70a   : > { %v1538_v60 = vmul.f32 %v2242_v59, %v2238_v42 }
 0x70c   : > { %2109 = vmatmul.msk.f32.vlgmr.msrb.gmra.mxu2 %vm1322_vm13, %v1538_v60 }
 0x74f   : > { %v1488_v1 = vpop.f32.mrf.mxu3 }
 0x750   : > { %v1491_v3 = vmul.f32 %v2797_v10, %v1488_v1 }
 0x752   : > { %v1492_v5 = vadd.f32 %v1491_v3, %v1421_v43  ;;  %v2221_v43 = vld [vmem:[%s3086_s29] ss:$0 sm:$0xff] }
 0x78f   : > { %v1559_v4 = vpop.f32.mrf.mxu2 }
 0x790   : > { %v1562_v6 = vmul.f32 %v2787_v2, %v1559_v4 }
 0x792   : > { %v1563_v7 = vadd.f32 %v1562_v6, %v1492_v5 }
 0x794   : > { %2110 = vmatmul.msk.f32.vlgmr.msra.gmra.mxu1 %vm1242_vm3, %v1563_v7 }
 0x811   : > { %v1592_v9 = vpop.f32.mrf.mxu1 }
 0x812   : > { %v1593_v11 = vadd.f32 %v2218_v8, %v1592_v9 }
 0x814   : > { %v2836_v10 = vadd.f32 %v1593_v11, %v2748_v19  ;;  %v1628_v19 = vld [vmem:[%s2622_s10] sm:$0xff]  ;;  %s3089_s10 = sld [smem:[#allocation36_spill]] (!%p2114_p1) }
 0x815   : > { %1654 = vmatpush.msra.mxu3 %v1628_v19 }
 0x816   : > { %v1598_v12 = vsel %vm1196_vm10, %v2836_v10, 0.0 }
 0x817   : > { %1599 = vadd.xlane.f32.xlu0 %v1598_v12 }
 0x88a   : > { %v1600_v2 = vpop.xlane.xlu0 %1599 }
 0x88b   : > { %v1601_v13 = vmul.f32 %v1600_v2, %v2752_v27 }
 0x88d   : > { %v1602_v14 = vsub.f32 %v2836_v10, %v1601_v13 }
 0x88f   : > { %v1603_v15 = vmul.f32 %v1602_v14, %v1602_v14 }
 0x891   : > { %v1604_v16 = vsel %vm1196_vm10, %v1603_v15, 0.0 }
 0x892   : > { %1605 = vadd.xlane.f32.xlu0 %v1604_v16 }
 0x905   : > { %v1606_v21 = vpop.xlane.xlu0 %1605 }
 0x906   : > { %v1607_v22 = vmul.f32 %v1606_v21, %v2752_v27 }
 0x908   : > { %v1608_v23 = vadd.f32 1e-05, %v1607_v22 }
 0x90a   : > { %2243 = vrsqrt.f32 %v1608_v23  ;;  %vm1615_vm15 = vweird.f32 %v1608_v23 }
 0x910   : > { %v2244_v24 = vpop.eup %2243 }
 0x911   : > { %v1610_v25 = vmul.f32 %v2244_v24, %v1608_v23  ;;  %vm1616_vm14 = vweird.f32 %v2244_v24 }
 0x912   : > { %vm1617_vm0 = vmor %vm1615_vm15, %vm1616_vm14 }
 0x913   : > { %v1611_v26 = vmul.f32 %v2244_v24, %v1610_v25 }
 0x915   : > { %v1612_v28 = vmul.f32 0.5, %v1611_v26 }
 0x917   : > { %v1613_v29 = vsub.f32 1.5, %v1612_v28 }
 0x919   : > { %v1614_v30 = vmul.f32 %v2244_v24, %v1613_v29 }
 0x91b   : > { %v1618_v32 = vsel %vm1617_vm0, %v2244_v24, %v1614_v30 }
 0x91c   : > { %v1619_v33 = vmul.f32 %v1618_v32, %v1602_v14 }
 0x91e   : > { %v1623_v35 = vmul.f32 %v2219_v31, %v1619_v33 }
 0x920   : > { %v1627_v36 = vadd.f32 %v2220_v34, %v1623_v35 }
 0x922   : > { %2111 = vmatmul.msk.f32.vlgmr.msra.gmra.mxu3 %vm1242_vm3, %v1627_v36 }
 0x9a5   : > { %v1656_v47 = vpop.f32.mrf.mxu3 }
 0x9a6   : > { %v1657_v48 = vadd.f32 %v2221_v43, %v1656_v47 }
 0x9a8   : > { %v2112_v50 = vmul.f32 -1.702, %v1657_v48 }
 0x9aa   : > { %v1661_v51 = vmul.f32 1.442695, %v2112_v50 }
 0x9ac   : > { %2245 = vpow2.f32 %v1661_v51 }
 0x9b2   : > { %v2246_v52 = vpop.eup %2245 }
 0x9b3   : > { %v1663_v53 = vadd.f32 1.0, %v2246_v52 }
 0x9b5   : > { %2247 = vrcp.f32 %v1663_v53  ;;  %v1675_v55 = vand.u32 2147483648, %v1663_v53  ;;  %v1673_v57 = vand.u32 2147483647, %v1663_v53  ;;  %vm1669_vm2 = vweird.f32 %v1663_v53 }
 0x9b7   : > { %v1676_v59 = vor.u32 1.1754944e-38, %v1675_v55  ;;  %vm1674_vm5 = vcmp.eq.f32.partialorder %v1673_v57, 8.507059e+37 }
 0x9bb   : > { %v2248_v54 = vpop.eup %2247 }
 0x9bc   : > { %v1665_v42 = vmul.f32 %v2248_v54, %v1663_v53  ;;  %vm1670_vm1 = vweird.f32 %v2248_v54 }
 0x9bd   : > { %vm1671_vm4 = vmor %vm1669_vm2, %vm1670_vm1 }
 0x9be   : > { %v1666_v44 = vsub.f32 1.0, %v1665_v42 }
 0x9c0   : > { %v1667_v56 = vmul.f32 %v2248_v54, %v1666_v44 }
 0x9c2   : > { %v1668_v58 = vadd.f32 %v2248_v54, %v1667_v56 }
 0x9c4   : > { %v1672_v60 = vsel %vm1671_vm4, %v2248_v54, %v1668_v58 }
 0x9c5   : > { %v1677_v61 = vsel %vm1674_vm5, %v1676_v59, %v1672_v60 }
 0x9c6   : > { %v1679_v62 = vmul.f32 %v1677_v61, %v1657_v48 }
 0x9c8   : > { %2113 = vmatmul.msk.f32.vlgmr.msrb.gmra.mxu0 %vm1692_vm6, %v1679_v62 }
 0xa45   : > { %v1713_v0 = vpop.f32.mrf.mxu0 }
 0xa46   : > { %v1714_v1 = vadd.f32 %v2222_v63, %v1713_v0  ;;  %1721 = sbr.rel (%p2114_p1) target bundleno = 3178 (0xc6a), region = 132 }
 0xa48   : > { %v1716_v3 = vadd.f32 %v1714_v1, %v2836_v10 }
 0xa4a   : > { %1717 = vst.msk [vmem:[#allocation2] sm:$0x1f] %vm1196_vm10, %v1716_v3 }
 0xa4b   : > { %vm1725_vm7 = vcmask 253952   ;;  %v1754_v10 = vld [vmem:[%s3088_s1 + $0x18] sm:$0xff]  ;;  %v1753_v12 = vld [vmem:[%s3088_s1 + $0x10] sm:$0xff]  ;;  %vm1757_vm10 = vcmask 64512   ;;  %v1756_v2 = vld [vmem:[%s3089_s10] sm:$0xff]  ;;  %s3094_s10 = sld [smem:[#allocation38_spill]] }
 0xa4c   : > { %1796 = vmatpush.msra.mxu1 %v1754_v10  ;;  %v1755_v13 = vld [vmem:[%s3091_s20] sm:$0x1]  ;;  %v1752_v14 = vld [vmem:[%s3088_s1 + $0x8] sm:$0xff]  ;;  %1776 = vmatpush.msra.mxu0 %v1756_v2  ;;  %v1813_v43 = vld [vmem:[#allocation3] sm:$0x1]  ;;  %vm1837_vm13 = vcmask 0  }
 0xa4d   : > { %2115 = vmatmul.msk.f32.vlgmr.msra.gmra.mxu0 %vm1757_vm10, %v1755_v13  ;;  %v1751_v15 = vld [vmem:[%s3088_s1] sm:$0xff] }
 0xa4e   : > { %1797 = vmatpush.msra.mxu1 %v1753_v12  ;;  %v1723_v25 = vld [vmem:[%s3092_s0] sm:$0x1] }
 0xa4f   : > { %v1804_v37 = vld [vmem:[%s3096_s9] sm:$0x1] }
 0xa50   : > { %1798 = vmatpush.msra.mxu1 %v1752_v14 }
 0xa51   : > { %v1722_v4 = vld [vmem:[#allocation2] sm:$0x1]  ;;  %s3095_s4 = smov %s3094_s10  ;;  %v1812_v31 = vld [vmem:[%s3094_s10 + $0x18] sm:$0xff] }
 0xa52   : > { %v1726_v5 = vsel %vm1725_vm7, %v1722_v4, 0.0  ;;  %1799 = vmatpush.msra.mxu1 %v1751_v15  ;;  %1829 = vmatpush.msra.mxu2 %v1812_v31  ;;  %v1811_v32 = vld [vmem:[%s3095_s4 + $0x10] sm:$0xff]  ;;  %v1810_v33 = vld [vmem:[%s3095_s4 + $0x8] sm:$0xff]  ;;  %v1809_v34 = vld [vmem:[%s3095_s4] sm:$0xff] }
 0xa53   : > { %1727 = vadd.xlane.f32.xlu0 %v1726_v5 }
 0xa54   : > { %1830 = vmatpush.msra.mxu2 %v1811_v32 }
 0xa56   : > { %1831 = vmatpush.msra.mxu2 %v1810_v33 }
 0xa58   : > { %1832 = vmatpush.msra.mxu2 %v1809_v34 }
 0xac6   : > { %v1728_v6 = vpop.xlane.xlu0 %1727 }
 0xac7   : > { %v1729_v7 = vmul.f32 %v1728_v6, %v2752_v27 }
 0xac9   : > { %v1730_v8 = vsub.f32 %v1722_v4, %v1729_v7 }
 0xaca   : > { %v1778_v35 = vpop.f32.mrf.mxu0 }
 0xacb   : > { %v1731_v9 = vmul.f32 %v1730_v8, %v1730_v8 }
 0xacd   : > { %v1732_v11 = vsel %vm1725_vm7, %v1731_v9, 0.0 }
 0xace   : > { %1733 = vadd.xlane.f32.xlu0 %v1732_v11 }
 0xb41   : > { %v1734_v16 = vpop.xlane.xlu0 %1733 }
 0xb42   : > { %v1735_v17 = vmul.f32 %v1734_v16, %v2752_v27  ;;  %v1724_v27 = vld [vmem:[%s3093_s2] sm:$0x1] }
 0xb44   : > { %v1736_v18 = vadd.f32 1e-05, %v1735_v17 }
 0xb46   : > { %2249 = vrsqrt.f32 %v1736_v18  ;;  %vm1743_vm9 = vweird.f32 %v1736_v18 }
 0xb4c   : > { %v2250_v20 = vpop.eup %2249 }
 0xb4d   : > { %v1738_v19 = vmul.f32 %v2250_v20, %v1736_v18  ;;  %vm1744_vm8 = vweird.f32 %v2250_v20 }
 0xb4e   : > { %vm1745_vm11 = vmor %vm1743_vm9, %vm1744_vm8 }
 0xb4f   : > { %v1739_v21 = vmul.f32 %v2250_v20, %v1738_v19 }
 0xb51   : > { %v1740_v22 = vmul.f32 0.5, %v1739_v21 }
 0xb53   : > { %v1741_v23 = vsub.f32 1.5, %v1740_v22 }
 0xb55   : > { %v1742_v24 = vmul.f32 %v2250_v20, %v1741_v23 }
 0xb57   : > { %v1746_v26 = vsel %vm1745_vm11, %v2250_v20, %v1742_v24 }
 0xb58   : > { %v1747_v28 = vmul.f32 %v1746_v26, %v1730_v8 }
 0xb5a   : > { %v1748_v29 = vmul.f32 %v1747_v28, %v1723_v25 }
 0xb5c   : > { %v1749_v30 = vadd.f32 %v1748_v29, %v1724_v27 }
 0xb5e   : > { %1750 = vst.msk [vmem:[%s2644_s11] sm:$0x1] %vm1725_vm7, %v1749_v30  ;;  %2116 = vmatmul.msk.f32.vlgmr.msra.gmra.mxu1 %vm1242_vm3, %v1749_v30 }
 0xbdb   : > { %v1801_v36 = vpop.f32.mrf.mxu1 }
 0xbdc   : > { %v1802_v38 = vadd.f32 %v1801_v36, %v1778_v35 }
 0xbde   : > { %v1805_v39 = vadd.f32 %v1804_v37, %v1802_v38 }
 0xbe0   : > { %vm1806_vm12 = vcmp.ge.f32.partialorder %v1805_v39, 0.0  ;;  %v1807_v40 = vmul.f32 0.2, %v1805_v39 }
 0xbe2   : > { %v1808_v41 = vsel %vm1806_vm12, %v1805_v39, %v1807_v40 }
 0xbe3   : > { %2117 = vmatmul.msk.f32.vlgmr.msra.gmra.mxu2 %vm1242_vm3, %v1808_v41 }
 0xc66   : > { %v1834_v45 = vpop.f32.mrf.mxu2 }
 0xc67   : > { %v1835_v46 = vadd.f32 %v1834_v45, %v1813_v43 }
 0xc69   : > { %1838 = vst.msk [vmem:[%s3097_s5] sm:$0x1] %vm1837_vm13, %v1835_v46 }
 0xc6a PF: > { %s3098_s2 = sld [smem:[#allocation9_spill]]  ;;  %s1856_s3 = sshll.u32 %s2644_s11, 4  ;;  %s1857_s3 = int_to_ptr.vmem [resolvable:$true] %s1856_s3 }
 0xc6b   : > { %s3099_s10 = sld [smem:[#allocation39_spill]]  ;;  %s3102_s29 = sand.u32 1, %s2321_s30  }
 0xc6c   : > { %s1843_s19 = scalar_lea.sflag [#allocation5], %s3102_s29 }
 0xc71   : > { %s3100_s22 = smov %s3099_s10  ;;  %s1854_s20 = scalar_lea.hbm %s3099_s10, %s3098_s2 }
 0xc72   : > { %s1858_s18 = sshll.u32 %s1854_s20, 4  ;;  %s2271_s23 = scalar_lea.hbm %s3100_s22, 2  ;;  %s1859_s18 = int_to_ptr.hbm [resolvable:$true] %s1858_s18 }
 0xc73   : > { %s2265_s24 = sshra.s32 %s1859_s18, 4  ;;  %s2266_s24 = int_to_ptr.hbm [resolvable:$true] %s2265_s24 }
 0xc74   : > { %s2267_s9 = scalar_lea.hbm %s2266_s24, 1  ;;  %p2272_p6 = scmp.lt.s32.totalorder %s2266_s24, %s3100_s22 }
 0xc75   : > { %p2268_p2 = scmp.ne.s32.totalorder %s2266_s24, %s2267_s9  ;;  %p2273_p7 = scmp.lt.s32.totalorder %s2271_s23, %s2267_s9 }
 0xc77   : > { %p2269_p4 = pnand %p2268_p2, %p2545_p3  ;;  %p2274_p8 = por %p2273_p7, %p2272_p6 }
 0xc79   : > { %p2270_p5 = pneg %p2269_p4 }
 0xc7b   : > { %p2275_p10 = pnand %p2274_p8, %p2270_p5 }
 0xc7d   : > { %2278 = shalt.err (!%p2275_p10)
}
 0xc7e   : > { %2125 = dma.vmem_to_hbm [thread:$0]  (%p2545_p3), %s1857_s3, 16, %s1859_s18, %s1843_s19  }
 0xc7f PF: > { %s3103_s11 = sld [smem:[#allocation12_spill]] }
 0xc80   : > { %s3104_s2 = sld [smem:[#allocation7_spill]] }
 0xc85   : > { %p2131_p11 = scmp.ge.s32.totalorder %s3103_s11, 2 }
 0xc86   : > { %s1876_s10 = sand.u32 1, %s3104_s2  }
 0xc87   : > { %p2128_p12 = pnand %p2131_p11, %p2555_p9  ;;  %s1877_s20 = scalar_lea.sflag [#allocation5], %s1876_s10 }
 0xc89   : > { %p2129_p13 = pneg %p2128_p12 }
 0xc8b   : > { %2312 = dma.done.wait (%p2129_p13), %s1877_s20, 16  }
 0xc8c   : > { %2314 = vsyncadd (%p2129_p13), %s1877_s20, 4294967280  ;;  %s43_s29 = sadd.s32 1, %s3103_s11   ;;  %s3106_s24 = sld [smem:[#allocation8_spill]] }
 0xc8d   : > { %p40_p0 = scmp.ge.s32.totalorder %s43_s29, 6   ;;  %s3107_s9 = sld [smem:[#allocation17_spill]] }
 0xc8e   : > { %s3108_s5 = sld [smem:[#allocation10_spill]]  ;;  %s3112_s8 = smov %s2321_s30 }
 0xc8f   : > { %s3109_s28 = sld [smem:[#allocation11_spill]]  ;;  %42 = sbr.rel (!%p40_p0) target bundleno = 26 (0x1a), region = 218 }
 0xc90   : > { %s3110_s0 = sld [smem:[#allocation13_spill]] }
 0xc91   : > { %s3111_s10 = sld [smem:[#allocation15_spill]] }
 0xc92   : > { %s3113_s30 = smov %s3106_s24 }
 0xc94   :  { %1882 = vsyncpa [#allocation5], 1 }
 0xc95   :  { %1884 = vsyncpa [#allocation5 + $0x1], 1 }

</bundles_post_ra>
